<compile_context>
chip_gen: v5e
topology: v5e:2x2
jax: 0.10.0
libtpu: 0.0.40
codegen_flags: <defaults>
</compile_context>

<pallas_src>
from types import SimpleNamespace

import numpy as np
import jax
import jax.numpy as jnp
from jax import lax
from jax.experimental import pallas as pl
from jax.experimental.pallas import tpu as pltpu


# -----------------------------------------------------------------------------
# Host-side constant matrices (hoisted out of the kernel per the perf review)
# -----------------------------------------------------------------------------
def _adaptive_avg_pool_matrix(l_in, l_out):
    """(l_out, l_in) averaging matrix matching nn.AdaptiveAvgPool1d."""
    i = np.arange(l_out)
    start = (i * l_in) // l_out
    end = -(-((i + 1) * l_in) // l_out)                      # ceil((i+1)*l_in/l_out)
    t = np.arange(l_in)
    mask = (t[None, :] >= start[:, None]) & (t[None, :] < end[:, None])
    return (mask / (end - start)[:, None].astype(np.float32)).astype(np.float32)


def _pool_select_matrices(l1, stride):
    """0/1 gather matrices implementing [conv stride] + MaxPool1d(2,2,1) over the
    stride-1 conv output of length l1.  pooled = max(left @ y, right @ y) with y >= 0
    (post-ReLU), which makes zero rows equivalent to PyTorch's -inf pooling pad."""
    ls = (l1 - 1) // stride + 1                              # strided conv length
    p = ls // 2 + 1                                          # MaxPool1d(2,2,1) length
    rows = np.arange(p)
    cols = np.arange(l1)

    def sel(idx):                                            # idx into strided output
        valid = (idx >= 0) & (idx < ls)
        src = np.where(valid, idx * stride, -1)              # index into stride-1 output
        return ((cols[None, :] == src[:, None]) & valid[:, None]).astype(np.float32)

    return sel(2 * rows - 1), sel(2 * rows), p


def _fold_conv_bn(w_oik, bn, eps):
    """Fold inference BatchNorm into the conv: returns im2col weight (K*C_in, C_out)
    with the BN scale baked in, plus the per-channel shift (1, C_out)."""
    gamma, beta, mean, var = bn
    scale = gamma / jnp.sqrt(var + eps)
    shift = (beta - mean * scale).reshape(1, -1)
    w_scaled = w_oik * scale[:, None, None]                  # (C_out, C_in, K)
    wmat = jnp.transpose(w_scaled, (2, 1, 0)).reshape(-1, w_oik.shape[0])
    return wmat.astype(jnp.float32), shift.astype(jnp.float32)


# -----------------------------------------------------------------------------
# Fused kernel: conv1+BN+ReLU+pool -> conv2+... -> conv3+... -> adaptive avg pool
# -----------------------------------------------------------------------------
def _make_fused_cnn_kernel(*, nb_items, taps, pads):
    k1, k2, k3 = taps
    pad1, pad2, pad3 = pads

    def conv_block(xv, xp_ref, pt_ref, wmat, shift, lmat, rmat, k, pad):
        l, c = xv.shape
        l1 = l + 2 * pad - k + 1
        # Stage the zero-padded input: zero ONLY the pad rows, interior fully rewritten.
        xp_ref[:pad, :] = jnp.zeros((pad, c), jnp.float32)
        xp_ref[pad + l:, :] = jnp.zeros((pad, c), jnp.float32)
        xp_ref[pad:pad + l, :] = xv
        # im2col patch: patch[t, k*C + cc] = xpad[t + k, cc]  (one pass per tap).
        for kk in range(k):
            pt_ref[:, kk * c:(kk + 1) * c] = xp_ref[kk:kk + l1, :]
        # Conv1d (+ folded BN scale) as ONE MXU matmul, then BN shift + ReLU.
        # TODO(synk): for scaled-up channel counts on v5e, cast operands to bf16 here.
        z = jnp.dot(pt_ref[...], wmat, preferred_element_type=jnp.float32)
        y = jnp.maximum(z + shift, 0.0)
        # Conv stride + MaxPool1d(2,2,1) via host-precomputed 0/1 selection matmuls.
        return jnp.maximum(jnp.dot(lmat, y, preferred_element_type=jnp.float32),
                           jnp.dot(rmat, y, preferred_element_type=jnp.float32))

    def kernel(x_ref,
               w1_ref, b1_ref, l1_ref, r1_ref,
               w2_ref, b2_ref, l2_ref, r2_ref,
               w3_ref, b3_ref, l3_ref, r3_ref,
               adapt_ref, o_ref,
               xp1, pt1, xp2, pt2, xp3, pt3):
        w1 = w1_ref[...]; b1 = b1_ref[...]; lm1 = l1_ref[...]; rm1 = r1_ref[...]
        w2 = w2_ref[...]; b2 = b2_ref[...]; lm2 = l2_ref[...]; rm2 = r2_ref[...]
        w3 = w3_ref[...]; b3 = b3_ref[...]; lm3 = l3_ref[...]; rm3 = r3_ref[...]
        adapt = adapt_ref[...]
        for i in range(nb_items):                      # static unroll; all in VMEM
            xv = x_ref[i].astype(jnp.float32)          # (L_in, C_in), channels on lanes
            p1 = conv_block(xv, xp1, pt1, w1, b1, lm1, rm1, k1, pad1)
            p2 = conv_block(p1, xp2, pt2, w2, b2, lm2, rm2, k2, pad2)
            p3 = conv_block(p2, xp3, pt3, w3, b3, lm3, rm3, k3, pad3)
            # AdaptiveAvgPool1d as one constant averaging matmul -> (F, C_out).
            o_ref[i] = jnp.dot(adapt, p3,
                               preferred_element_type=jnp.float32).astype(o_ref.dtype)

    return kernel


# -----------------------------------------------------------------------------
# Wrapper: full CNN forward as a single pallas_call
# -----------------------------------------------------------------------------
def cnn_forward(x_ncl, params, cfg, eps=1e-5):
    """Inference-mode forward of the PyTorch CNN as one fused Pallas TPU kernel."""
    # TODO(synk): training-mode Dropout / batch-statistics BatchNorm not implemented.
    n, c_in, l_in = x_ncl.shape
    k1 = params["w1"].shape[2]; pad1 = cfg.kernel_size // 2; stride1 = cfg.stride
    k2 = params["w2"].shape[2]; pad2 = 4
    k3 = params["w3"].shape[2]; pad3 = 4
    c1 = params["w1"].shape[0]; c2 = params["w2"].shape[0]; c3 = params["w3"].shape[0]
    f_len = cfg.features_len

    # BN folded into conv weights (scale) + per-channel shift.
    w1m, b1 = _fold_conv_bn(params["w1"], params["bn1"], eps)
    w2m, b2 = _fold_conv_bn(params["w2"], params["bn2"], eps)
    w3m, b3 = _fold_conv_bn(params["w3"], params["bn3"], eps)

    # Static lengths + host-precomputed selection / averaging matrices.
    l1_1 = l_in + 2 * pad1 - k1 + 1
    lm1, rm1, p1 = _pool_select_matrices(l1_1, stride1)
    l1_2 = p1 + 2 * pad2 - k2 + 1
    lm2, rm2, p2 = _pool_select_matrices(l1_2, 1)
    l1_3 = p2 + 2 * pad3 - k3 + 1
    lm3, rm3, p3 = _pool_select_matrices(l1_3, 1)
    adapt = _adaptive_avg_pool_matrix(p3, f_len)             # (F, P3)

    # Channels-last internal layout: channels on the TPU lane axis.
    x = jnp.transpose(x_ncl, (0, 2, 1)).astype(jnp.float32)  # (N, L, C_in)

    # 2-way "parallel" batch split so v7x's two TensorCores each take half the batch;
    # on v5e/v6e this is just one extra sequential grid step.
    nb = 2 if (n >= 2 and n % 2 == 0) else 1
    nb_items = n // nb

    kernel = _make_fused_cnn_kernel(nb_items=nb_items, taps=(k1, k2, k3),
                                    pads=(pad1, pad2, pad3))

    consts = [w1m, b1, jnp.asarray(lm1), jnp.asarray(rm1),
              w2m, b2, jnp.asarray(lm2), jnp.asarray(rm2),
              w3m, b3, jnp.asarray(lm3), jnp.asarray(rm3),
              jnp.asarray(adapt)]
    const_specs = [pl.BlockSpec(c.shape, lambda i: (0, 0)) for c in consts]

    flops = n * (2 * l1_1 * k1 * c_in * c1 + 4 * p1 * l1_1 * c1
                 + 2 * l1_2 * k2 * c1 * c2 + 4 * p2 * l1_2 * c2
                 + 2 * l1_3 * k3 * c2 * c3 + 4 * p3 * l1_3 * c3
                 + 2 * f_len * p3 * c3)
    bytes_accessed = 4 * (int(x.size) + sum(int(c.size) for c in consts)
                          + n * f_len * c3)

    out = pl.pallas_call(
        kernel,
        out_shape=jax.ShapeDtypeStruct((n, f_len, c3), jnp.float32),
        grid_spec=pltpu.PrefetchScalarGridSpec(
            num_scalar_prefetch=0,
            grid=(nb,),
            in_specs=[pl.BlockSpec((nb_items, l_in, c_in), lambda i: (i, 0, 0))]
                     + const_specs,
            out_specs=pl.BlockSpec((nb_items, f_len, c3), lambda i: (i, 0, 0)),
            scratch_shapes=[
                pltpu.VMEM((l_in + 2 * pad1, c_in), jnp.float32),   # padded in, blk 1
                pltpu.VMEM((l1_1, k1 * c_in), jnp.float32),         # im2col,    blk 1
                pltpu.VMEM((p1 + 2 * pad2, c1), jnp.float32),       # padded in, blk 2
                pltpu.VMEM((l1_2, k2 * c1), jnp.float32),           # im2col,    blk 2
                pltpu.VMEM((p2 + 2 * pad3, c2), jnp.float32),       # padded in, blk 3
                pltpu.VMEM((l1_3, k3 * c2), jnp.float32),           # im2col,    blk 3
            ],
        ),
        compiler_params=pltpu.CompilerParams(
            dimension_semantics=("parallel",)),                     # batch across TCs
        cost_estimate=pl.CostEstimate(flops=int(flops), transcendentals=0,
                                      bytes_accessed=int(bytes_accessed)),
    )(x, *consts)

    # PyTorch flattens (N, C, F) channel-major; kernel emits (N, F, C) (lane-dense
    # store).  The final transpose+reshape is a single tiny XLA op on 512 bytes.
    return jnp.transpose(out, (0, 2, 1)).reshape(n, -1)


# -----------------------------------------------------------------------------
# Pure-JAX reference (PyTorch eval-mode semantics)
# -----------------------------------------------------------------------------
def _reference_forward(x_ncl, params, cfg, eps=1e-5):
    def conv1d(x, w, stride, pad):
        return lax.conv_general_dilated(
            x, w, window_strides=(stride,), padding=[(pad, pad)],
            dimension_numbers=("NCH", "OIH", "NCH"))

    def bn(x, p):
        gamma, beta, mean, var = p
        inv = 1.0 / jnp.sqrt(var + eps)
        return (x - mean[None, :, None]) * (gamma * inv)[None, :, None] \
            + beta[None, :, None]

    def maxpool(x):
        return lax.reduce_window(x, -jnp.inf, lax.max,
                                 window_dimensions=(1, 1, 2),
                                 window_strides=(1, 1, 2),
                                 padding=[(0, 0), (0, 0), (1, 1)])

    x = maxpool(jnp.maximum(bn(conv1d(x_ncl, params["w1"], cfg.stride,
                                      cfg.kernel_size // 2), params["bn1"]), 0.0))
    x = maxpool(jnp.maximum(bn(conv1d(x, params["w2"], 1, 4), params["bn2"]), 0.0))
    x = maxpool(jnp.maximum(bn(conv1d(x, params["w3"], 1, 4), params["bn3"]), 0.0))
    a = jnp.asarray(_adaptive_avg_pool_matrix(x.shape[-1], cfg.features_len))
    x = jnp.einsum("ncl,fl->ncf", x, a)
    return x.reshape(x.shape[0], -1)


# -----------------------------------------------------------------------------
if __name__ == "__main__":
    cfg = SimpleNamespace(input_channels=4, mid_channels=8, final_out_channels=16,
                          kernel_size=8, stride=1, dropout=0.1, features_len=4)

    key = jax.random.PRNGKey(0)
    keys = jax.random.split(key, 8)
    n_batch, seq_len = 2, 32
    x = jax.random.normal(keys[0], (n_batch, cfg.input_channels, seq_len),
                          dtype=jnp.float32)

    def bn_params(k, c):
        k1, k2, k3, k4 = jax.random.split(k, 4)
        gamma = 1.0 + 0.1 * jax.random.normal(k1, (c,), jnp.float32)
        beta = 0.1 * jax.random.normal(k2, (c,), jnp.float32)
        mean = 0.1 * jax.random.normal(k3, (c,), jnp.float32)
        var = jax.random.uniform(k4, (c,), jnp.float32, 0.5, 1.5)
        return (gamma, beta, mean, var)

    params = {
        "w1": 0.2 * jax.random.normal(
            keys[1], (cfg.mid_channels, cfg.input_channels, cfg.kernel_size),
            jnp.float32),
        "bn1": bn_params(keys[2], cfg.mid_channels),
        "w2": 0.2 * jax.random.normal(
            keys[3], (cfg.mid_channels * 2, cfg.mid_channels, 8), jnp.float32),
        "bn2": bn_params(keys[4], cfg.mid_channels * 2),
        "w3": 0.2 * jax.random.normal(
            keys[5], (cfg.final_out_channels, cfg.mid_channels * 2, 8), jnp.float32),
        "bn3": bn_params(keys[6], cfg.final_out_channels),
    }

    forward = jax.jit(lambda xx, pp: cnn_forward(xx, pp, cfg))
    out = jax.block_until_ready(forward(x, params))

    ref = _reference_forward(x, params, cfg)
    assert out.shape == (n_batch, cfg.final_out_channels * cfg.features_len), out.shape
    assert jnp.allclose(out, ref, atol=1e-4, rtol=1e-4), \
        float(jnp.max(jnp.abs(out - ref)))

    print("KERNEL_OK")
</pallas_src>

<mosaic_0001>
module attributes {stable_mosaic.version = 11 : i64} {
  func.func @kernel(%arg0: i32, %arg1: memref<1x32x4xf32, #tpu.memory_space<vmem>>, %arg2: memref<32x8xf32, #tpu.memory_space<vmem>>, %arg3: memref<1x8xf32, #tpu.memory_space<vmem>>, %arg4: memref<17x33xf32, #tpu.memory_space<vmem>>, %arg5: memref<17x33xf32, #tpu.memory_space<vmem>>, %arg6: memref<64x16xf32, #tpu.memory_space<vmem>>, %arg7: memref<1x16xf32, #tpu.memory_space<vmem>>, %arg8: memref<10x18xf32, #tpu.memory_space<vmem>>, %arg9: memref<10x18xf32, #tpu.memory_space<vmem>>, %arg10: memref<128x16xf32, #tpu.memory_space<vmem>>, %arg11: memref<1x16xf32, #tpu.memory_space<vmem>>, %arg12: memref<6x11xf32, #tpu.memory_space<vmem>>, %arg13: memref<6x11xf32, #tpu.memory_space<vmem>>, %arg14: memref<4x6xf32, #tpu.memory_space<vmem>>, %arg15: memref<1x4x16xf32, #tpu.memory_space<vmem>>, %arg16: memref<40x4xf32, #tpu.memory_space<vmem>>, %arg17: memref<33x32xf32, #tpu.memory_space<vmem>>, %arg18: memref<25x8xf32, #tpu.memory_space<vmem>>, %arg19: memref<18x64xf32, #tpu.memory_space<vmem>>, %arg20: memref<18x16xf32, #tpu.memory_space<vmem>>, %arg21: memref<11x128xf32, #tpu.memory_space<vmem>>) attributes {dimension_semantics = [#tpu.dimension_semantics<parallel>], iteration_bounds = array<i64: 2>, scalar_prefetch = 0 : i64, scratch_operands = 6 : i64, tpu.core_type = #tpu.core_type<tc>, window_params = [{transform_indices = @transform_0, window_bounds = array<i64: 1, 32, 4>}, {pipeline_mode = #tpu.pipeline_mode<synchronous>, transform_indices = @transform_1, window_bounds = array<i64: 32, 8>}, {pipeline_mode = #tpu.pipeline_mode<synchronous>, transform_indices = @transform_2, window_bounds = array<i64: 1, 8>}, {pipeline_mode = #tpu.pipeline_mode<synchronous>, transform_indices = @transform_3, window_bounds = array<i64: 17, 33>}, {pipeline_mode = #tpu.pipeline_mode<synchronous>, transform_indices = @transform_4, window_bounds = array<i64: 17, 33>}, {pipeline_mode = #tpu.pipeline_mode<synchronous>, transform_indices = @transform_5, window_bounds = array<i64: 64, 16>}, {pipeline_mode = #tpu.pipeline_mode<synchronous>, transform_indices = @transform_6, window_bounds = array<i64: 1, 16>}, {pipeline_mode = #tpu.pipeline_mode<synchronous>, transform_indices = @transform_7, window_bounds = array<i64: 10, 18>}, {pipeline_mode = #tpu.pipeline_mode<synchronous>, transform_indices = @transform_8, window_bounds = array<i64: 10, 18>}, {pipeline_mode = #tpu.pipeline_mode<synchronous>, transform_indices = @transform_9, window_bounds = array<i64: 128, 16>}, {pipeline_mode = #tpu.pipeline_mode<synchronous>, transform_indices = @transform_10, window_bounds = array<i64: 1, 16>}, {pipeline_mode = #tpu.pipeline_mode<synchronous>, transform_indices = @transform_11, window_bounds = array<i64: 6, 11>}, {pipeline_mode = #tpu.pipeline_mode<synchronous>, transform_indices = @transform_12, window_bounds = array<i64: 6, 11>}, {pipeline_mode = #tpu.pipeline_mode<synchronous>, transform_indices = @transform_13, window_bounds = array<i64: 4, 6>}, {transform_indices = @transform_14, window_bounds = array<i64: 1, 4, 16>}]} {
    %c0 = arith.constant 0 : index
    %c0_0 = arith.constant 0 : index
    %0 = vector.load %arg2[%c0, %c0_0] : memref<32x8xf32, #tpu.memory_space<vmem>>, vector<32x8xf32>
    %c0_1 = arith.constant 0 : index
    %c0_2 = arith.constant 0 : index
    %1 = vector.load %arg3[%c0_1, %c0_2] : memref<1x8xf32, #tpu.memory_space<vmem>>, vector<1x8xf32>
    %c0_3 = arith.constant 0 : index
    %c0_4 = arith.constant 0 : index
    %2 = vector.load %arg4[%c0_3, %c0_4] : memref<17x33xf32, #tpu.memory_space<vmem>>, vector<17x33xf32>
    %c0_5 = arith.constant 0 : index
    %c0_6 = arith.constant 0 : index
    %3 = vector.load %arg5[%c0_5, %c0_6] : memref<17x33xf32, #tpu.memory_space<vmem>>, vector<17x33xf32>
    %c0_7 = arith.constant 0 : index
    %c0_8 = arith.constant 0 : index
    %4 = vector.load %arg6[%c0_7, %c0_8] : memref<64x16xf32, #tpu.memory_space<vmem>>, vector<64x16xf32>
    %c0_9 = arith.constant 0 : index
    %c0_10 = arith.constant 0 : index
    %5 = vector.load %arg7[%c0_9, %c0_10] : memref<1x16xf32, #tpu.memory_space<vmem>>, vector<1x16xf32>
    %c0_11 = arith.constant 0 : index
    %c0_12 = arith.constant 0 : index
    %6 = vector.load %arg8[%c0_11, %c0_12] : memref<10x18xf32, #tpu.memory_space<vmem>>, vector<10x18xf32>
    %c0_13 = arith.constant 0 : index
    %c0_14 = arith.constant 0 : index
    %7 = vector.load %arg9[%c0_13, %c0_14] : memref<10x18xf32, #tpu.memory_space<vmem>>, vector<10x18xf32>
    %c0_15 = arith.constant 0 : index
    %c0_16 = arith.constant 0 : index
    %8 = vector.load %arg10[%c0_15, %c0_16] : memref<128x16xf32, #tpu.memory_space<vmem>>, vector<128x16xf32>
    %c0_17 = arith.constant 0 : index
    %c0_18 = arith.constant 0 : index
    %9 = vector.load %arg11[%c0_17, %c0_18] : memref<1x16xf32, #tpu.memory_space<vmem>>, vector<1x16xf32>
    %c0_19 = arith.constant 0 : index
    %c0_20 = arith.constant 0 : index
    %10 = vector.load %arg12[%c0_19, %c0_20] : memref<6x11xf32, #tpu.memory_space<vmem>>, vector<6x11xf32>
    %c0_21 = arith.constant 0 : index
    %c0_22 = arith.constant 0 : index
    %11 = vector.load %arg13[%c0_21, %c0_22] : memref<6x11xf32, #tpu.memory_space<vmem>>, vector<6x11xf32>
    %c0_23 = arith.constant 0 : index
    %c0_24 = arith.constant 0 : index
    %12 = vector.load %arg14[%c0_23, %c0_24] : memref<4x6xf32, #tpu.memory_space<vmem>>, vector<4x6xf32>
    %c0_25 = arith.constant 0 : index
    %c0_26 = arith.constant 0 : index
    %c0_27 = arith.constant 0 : index
    %13 = vector.load %arg1[%c0_25, %c0_26, %c0_27] : memref<1x32x4xf32, #tpu.memory_space<vmem>>, vector<1x32x4xf32>
    %14 = vector.shape_cast %13 : vector<1x32x4xf32> to vector<32x4xf32>
    %cst = arith.constant 0.000000e+00 : f32
    %15 = vector.broadcast %cst : f32 to vector<4x4xf32>
    %c0_28 = arith.constant 0 : index
    %c0_29 = arith.constant 0 : index
    %16 = vector.load %arg16[%c0_28, %c0_29] : memref<40x4xf32, #tpu.memory_space<vmem>>, vector<4x4xf32>
    tpu.vector_store %arg16[%c0_28, %c0_29], %15 {strides = array<i32>} : memref<40x4xf32, #tpu.memory_space<vmem>>, vector<4x4xf32>,
    %cst_30 = arith.constant 0.000000e+00 : f32
    %17 = vector.broadcast %cst_30 : f32 to vector<4x4xf32>
    %c36 = arith.constant 36 : index
    %c0_31 = arith.constant 0 : index
    %18 = vector.load %arg16[%c36, %c0_31] : memref<40x4xf32, #tpu.memory_space<vmem>>, vector<4x4xf32>
    tpu.vector_store %arg16[%c36, %c0_31], %17 {strides = array<i32>} : memref<40x4xf32, #tpu.memory_space<vmem>>, vector<4x4xf32>,
    %c4 = arith.constant 4 : index
    %c0_32 = arith.constant 0 : index
    %19 = vector.load %arg16[%c4, %c0_32] : memref<40x4xf32, #tpu.memory_space<vmem>>, vector<32x4xf32>
    tpu.vector_store %arg16[%c4, %c0_32], %14 {strides = array<i32>} : memref<40x4xf32, #tpu.memory_space<vmem>>, vector<32x4xf32>,
    %c0_33 = arith.constant 0 : index
    %c0_34 = arith.constant 0 : index
    %20 = vector.load %arg16[%c0_33, %c0_34] : memref<40x4xf32, #tpu.memory_space<vmem>>, vector<33x4xf32>
    %c0_35 = arith.constant 0 : index
    %c0_36 = arith.constant 0 : index
    %21 = vector.load %arg17[%c0_35, %c0_36] : memref<33x32xf32, #tpu.memory_space<vmem>>, vector<33x4xf32>
    tpu.vector_store %arg17[%c0_35, %c0_36], %20 {strides = array<i32>} : memref<33x32xf32, #tpu.memory_space<vmem>>, vector<33x4xf32>,
    %c1 = arith.constant 1 : index
    %c0_37 = arith.constant 0 : index
    %22 = vector.load %arg16[%c1, %c0_37] : memref<40x4xf32, #tpu.memory_space<vmem>>, vector<33x4xf32>
    %c0_38 = arith.constant 0 : index
    %c4_39 = arith.constant 4 : index
    %23 = vector.load %arg17[%c0_38, %c4_39] : memref<33x32xf32, #tpu.memory_space<vmem>>, vector<33x4xf32>
    tpu.vector_store %arg17[%c0_38, %c4_39], %22 {strides = array<i32>} : memref<33x32xf32, #tpu.memory_space<vmem>>, vector<33x4xf32>,
    %c2 = arith.constant 2 : index
    %c0_40 = arith.constant 0 : index
    %24 = vector.load %arg16[%c2, %c0_40] : memref<40x4xf32, #tpu.memory_space<vmem>>, vector<33x4xf32>
    %c0_41 = arith.constant 0 : index
    %c8 = arith.constant 8 : index
    %25 = vector.load %arg17[%c0_41, %c8] : memref<33x32xf32, #tpu.memory_space<vmem>>, vector<33x4xf32>
    tpu.vector_store %arg17[%c0_41, %c8], %24 {strides = array<i32>} : memref<33x32xf32, #tpu.memory_space<vmem>>, vector<33x4xf32>,
    %c3 = arith.constant 3 : index
    %c0_42 = arith.constant 0 : index
    %26 = vector.load %arg16[%c3, %c0_42] : memref<40x4xf32, #tpu.memory_space<vmem>>, vector<33x4xf32>
    %c0_43 = arith.constant 0 : index
    %c12 = arith.constant 12 : index
    %27 = vector.load %arg17[%c0_43, %c12] : memref<33x32xf32, #tpu.memory_space<vmem>>, vector<33x4xf32>
    tpu.vector_store %arg17[%c0_43, %c12], %26 {strides = array<i32>} : memref<33x32xf32, #tpu.memory_space<vmem>>, vector<33x4xf32>,
    %c4_44 = arith.constant 4 : index
    %c0_45 = arith.constant 0 : index
    %28 = vector.load %arg16[%c4_44, %c0_45] : memref<40x4xf32, #tpu.memory_space<vmem>>, vector<33x4xf32>
    %c0_46 = arith.constant 0 : index
    %c16 = arith.constant 16 : index
    %29 = vector.load %arg17[%c0_46, %c16] : memref<33x32xf32, #tpu.memory_space<vmem>>, vector<33x4xf32>
    tpu.vector_store %arg17[%c0_46, %c16], %28 {strides = array<i32>} : memref<33x32xf32, #tpu.memory_space<vmem>>, vector<33x4xf32>,
    %c5 = arith.constant 5 : index
    %c0_47 = arith.constant 0 : index
    %30 = vector.load %arg16[%c5, %c0_47] : memref<40x4xf32, #tpu.memory_space<vmem>>, vector<33x4xf32>
    %c0_48 = arith.constant 0 : index
    %c20 = arith.constant 20 : index
    %31 = vector.load %arg17[%c0_48, %c20] : memref<33x32xf32, #tpu.memory_space<vmem>>, vector<33x4xf32>
    tpu.vector_store %arg17[%c0_48, %c20], %30 {strides = array<i32>} : memref<33x32xf32, #tpu.memory_space<vmem>>, vector<33x4xf32>,
    %c6 = arith.constant 6 : index
    %c0_49 = arith.constant 0 : index
    %32 = vector.load %arg16[%c6, %c0_49] : memref<40x4xf32, #tpu.memory_space<vmem>>, vector<33x4xf32>
    %c0_50 = arith.constant 0 : index
    %c24 = arith.constant 24 : index
    %33 = vector.load %arg17[%c0_50, %c24] : memref<33x32xf32, #tpu.memory_space<vmem>>, vector<33x4xf32>
    tpu.vector_store %arg17[%c0_50, %c24], %32 {strides = array<i32>} : memref<33x32xf32, #tpu.memory_space<vmem>>, vector<33x4xf32>,
    %c7 = arith.constant 7 : index
    %c0_51 = arith.constant 0 : index
    %34 = vector.load %arg16[%c7, %c0_51] : memref<40x4xf32, #tpu.memory_space<vmem>>, vector<33x4xf32>
    %c0_52 = arith.constant 0 : index
    %c28 = arith.constant 28 : index
    %35 = vector.load %arg17[%c0_52, %c28] : memref<33x32xf32, #tpu.memory_space<vmem>>, vector<33x4xf32>
    tpu.vector_store %arg17[%c0_52, %c28], %34 {strides = array<i32>} : memref<33x32xf32, #tpu.memory_space<vmem>>, vector<33x4xf32>,
    %c0_53 = arith.constant 0 : index
    %c0_54 = arith.constant 0 : index
    %36 = vector.load %arg17[%c0_53, %c0_54] : memref<33x32xf32, #tpu.memory_space<vmem>>, vector<33x32xf32>
    %cst_55 = arith.constant dense<0.000000e+00> : vector<33x8xf32>
    %37 = tpu.matmul %36, %0, %cst_55 {dimension_numbers = #tpu.dot_dimension_numbers<[1], [0], [0], [1], [0, 0, 1, 1], [], []>} : vector<33x32xf32>, vector<32x8xf32>, vector<33x8xf32> -> vector<33x8xf32>
    %38 = vector.broadcast %1 : vector<1x8xf32> to vector<33x8xf32>
    %39 = arith.addf %37, %38 : vector<33x8xf32>
    %cst_56 = arith.constant 0.000000e+00 : f32
    %40 = vector.broadcast %cst_56 : f32 to vector<33x8xf32>
    %41 = arith.maximumf %39, %40 : vector<33x8xf32>
    %cst_57 = arith.constant dense<0.000000e+00> : vector<17x8xf32>
    %42 = tpu.matmul %2, %41, %cst_57 {dimension_numbers = #tpu.dot_dimension_numbers<[1], [0], [0], [1], [0, 0, 1, 1], [], []>} : vector<17x33xf32>, vector<33x8xf32>, vector<17x8xf32> -> vector<17x8xf32>
    %cst_58 = arith.constant dense<0.000000e+00> : vector<17x8xf32>
    %43 = tpu.matmul %3, %41, %cst_58 {dimension_numbers = #tpu.dot_dimension_numbers<[1], [0], [0], [1], [0, 0, 1, 1], [], []>} : vector<17x33xf32>, vector<33x8xf32>, vector<17x8xf32> -> vector<17x8xf32>
    %44 = arith.maximumf %42, %43 : vector<17x8xf32>
    %cst_59 = arith.constant 0.000000e+00 : f32
    %45 = vector.broadcast %cst_59 : f32 to vector<4x8xf32>
    %c0_60 = arith.constant 0 : index
    %c0_61 = arith.constant 0 : index
    %46 = vector.load %arg18[%c0_60, %c0_61] : memref<25x8xf32, #tpu.memory_space<vmem>>, vector<4x8xf32>
    tpu.vector_store %arg18[%c0_60, %c0_61], %45 {strides = array<i32>} : memref<25x8xf32, #tpu.memory_space<vmem>>, vector<4x8xf32>,
    %cst_62 = arith.constant 0.000000e+00 : f32
    %47 = vector.broadcast %cst_62 : f32 to vector<4x8xf32>
    %c21 = arith.constant 21 : index
    %c0_63 = arith.constant 0 : index
    %48 = vector.load %arg18[%c21, %c0_63] : memref<25x8xf32, #tpu.memory_space<vmem>>, vector<4x8xf32>
    tpu.vector_store %arg18[%c21, %c0_63], %47 {strides = array<i32>} : memref<25x8xf32, #tpu.memory_space<vmem>>, vector<4x8xf32>,
    %c4_64 = arith.constant 4 : index
    %c0_65 = arith.constant 0 : index
    %49 = vector.load %arg18[%c4_64, %c0_65] : memref<25x8xf32, #tpu.memory_space<vmem>>, vector<17x8xf32>
    tpu.vector_store %arg18[%c4_64, %c0_65], %44 {strides = array<i32>} : memref<25x8xf32, #tpu.memory_space<vmem>>, vector<17x8xf32>,
    %c0_66 = arith.constant 0 : index
    %c0_67 = arith.constant 0 : index
    %50 = vector.load %arg18[%c0_66, %c0_67] : memref<25x8xf32, #tpu.memory_space<vmem>>, vector<18x8xf32>
    %c0_68 = arith.constant 0 : index
    %c0_69 = arith.constant 0 : index
    %51 = vector.load %arg19[%c0_68, %c0_69] : memref<18x64xf32, #tpu.memory_space<vmem>>, vector<18x8xf32>
    tpu.vector_store %arg19[%c0_68, %c0_69], %50 {strides = array<i32>} : memref<18x64xf32, #tpu.memory_space<vmem>>, vector<18x8xf32>,
    %c1_70 = arith.constant 1 : index
    %c0_71 = arith.constant 0 : index
    %52 = vector.load %arg18[%c1_70, %c0_71] : memref<25x8xf32, #tpu.memory_space<vmem>>, vector<18x8xf32>
    %c0_72 = arith.constant 0 : index
    %c8_73 = arith.constant 8 : index
    %53 = vector.load %arg19[%c0_72, %c8_73] : memref<18x64xf32, #tpu.memory_space<vmem>>, vector<18x8xf32>
    tpu.vector_store %arg19[%c0_72, %c8_73], %52 {strides = array<i32>} : memref<18x64xf32, #tpu.memory_space<vmem>>, vector<18x8xf32>,
    %c2_74 = arith.constant 2 : index
    %c0_75 = arith.constant 0 : index
    %54 = vector.load %arg18[%c2_74, %c0_75] : memref<25x8xf32, #tpu.memory_space<vmem>>, vector<18x8xf32>
    %c0_76 = arith.constant 0 : index
    %c16_77 = arith.constant 16 : index
    %55 = vector.load %arg19[%c0_76, %c16_77] : memref<18x64xf32, #tpu.memory_space<vmem>>, vector<18x8xf32>
    tpu.vector_store %arg19[%c0_76, %c16_77], %54 {strides = array<i32>} : memref<18x64xf32, #tpu.memory_space<vmem>>, vector<18x8xf32>,
    %c3_78 = arith.constant 3 : index
    %c0_79 = arith.constant 0 : index
    %56 = vector.load %arg18[%c3_78, %c0_79] : memref<25x8xf32, #tpu.memory_space<vmem>>, vector<18x8xf32>
    %c0_80 = arith.constant 0 : index
    %c24_81 = arith.constant 24 : index
    %57 = vector.load %arg19[%c0_80, %c24_81] : memref<18x64xf32, #tpu.memory_space<vmem>>, vector<18x8xf32>
    tpu.vector_store %arg19[%c0_80, %c24_81], %56 {strides = array<i32>} : memref<18x64xf32, #tpu.memory_space<vmem>>, vector<18x8xf32>,
    %c4_82 = arith.constant 4 : index
    %c0_83 = arith.constant 0 : index
    %58 = vector.load %arg18[%c4_82, %c0_83] : memref<25x8xf32, #tpu.memory_space<vmem>>, vector<18x8xf32>
    %c0_84 = arith.constant 0 : index
    %c32 = arith.constant 32 : index
    %59 = vector.load %arg19[%c0_84, %c32] : memref<18x64xf32, #tpu.memory_space<vmem>>, vector<18x8xf32>
    tpu.vector_store %arg19[%c0_84, %c32], %58 {strides = array<i32>} : memref<18x64xf32, #tpu.memory_space<vmem>>, vector<18x8xf32>,
    %c5_85 = arith.constant 5 : index
    %c0_86 = arith.constant 0 : index
    %60 = vector.load %arg18[%c5_85, %c0_86] : memref<25x8xf32, #tpu.memory_space<vmem>>, vector<18x8xf32>
    %c0_87 = arith.constant 0 : index
    %c40 = arith.constant 40 : index
    %61 = vector.load %arg19[%c0_87, %c40] : memref<18x64xf32, #tpu.memory_space<vmem>>, vector<18x8xf32>
    tpu.vector_store %arg19[%c0_87, %c40], %60 {strides = array<i32>} : memref<18x64xf32, #tpu.memory_space<vmem>>, vector<18x8xf32>,
    %c6_88 = arith.constant 6 : index
    %c0_89 = arith.constant 0 : index
    %62 = vector.load %arg18[%c6_88, %c0_89] : memref<25x8xf32, #tpu.memory_space<vmem>>, vector<18x8xf32>
    %c0_90 = arith.constant 0 : index
    %c48 = arith.constant 48 : index
    %63 = vector.load %arg19[%c0_90, %c48] : memref<18x64xf32, #tpu.memory_space<vmem>>, vector<18x8xf32>
    tpu.vector_store %arg19[%c0_90, %c48], %62 {strides = array<i32>} : memref<18x64xf32, #tpu.memory_space<vmem>>, vector<18x8xf32>,
    %c7_91 = arith.constant 7 : index
    %c0_92 = arith.constant 0 : index
    %64 = vector.load %arg18[%c7_91, %c0_92] : memref<25x8xf32, #tpu.memory_space<vmem>>, vector<18x8xf32>
    %c0_93 = arith.constant 0 : index
    %c56 = arith.constant 56 : index
    %65 = vector.load %arg19[%c0_93, %c56] : memref<18x64xf32, #tpu.memory_space<vmem>>, vector<18x8xf32>
    tpu.vector_store %arg19[%c0_93, %c56], %64 {strides = array<i32>} : memref<18x64xf32, #tpu.memory_space<vmem>>, vector<18x8xf32>,
    %c0_94 = arith.constant 0 : index
    %c0_95 = arith.constant 0 : index
    %66 = vector.load %arg19[%c0_94, %c0_95] : memref<18x64xf32, #tpu.memory_space<vmem>>, vector<18x64xf32>
    %cst_96 = arith.constant dense<0.000000e+00> : vector<18x16xf32>
    %67 = tpu.matmul %66, %4, %cst_96 {dimension_numbers = #tpu.dot_dimension_numbers<[1], [0], [0], [1], [0, 0, 1, 1], [], []>} : vector<18x64xf32>, vector<64x16xf32>, vector<18x16xf32> -> vector<18x16xf32>
    %68 = vector.broadcast %5 : vector<1x16xf32> to vector<18x16xf32>
    %69 = arith.addf %67, %68 : vector<18x16xf32>
    %cst_97 = arith.constant 0.000000e+00 : f32
    %70 = vector.broadcast %cst_97 : f32 to vector<18x16xf32>
    %71 = arith.maximumf %69, %70 : vector<18x16xf32>
    %cst_98 = arith.constant dense<0.000000e+00> : vector<10x16xf32>
    %72 = tpu.matmul %6, %71, %cst_98 {dimension_numbers = #tpu.dot_dimension_numbers<[1], [0], [0], [1], [0, 0, 1, 1], [], []>} : vector<10x18xf32>, vector<18x16xf32>, vector<10x16xf32> -> vector<10x16xf32>
    %cst_99 = arith.constant dense<0.000000e+00> : vector<10x16xf32>
    %73 = tpu.matmul %7, %71, %cst_99 {dimension_numbers = #tpu.dot_dimension_numbers<[1], [0], [0], [1], [0, 0, 1, 1], [], []>} : vector<10x18xf32>, vector<18x16xf32>, vector<10x16xf32> -> vector<10x16xf32>
    %74 = arith.maximumf %72, %73 : vector<10x16xf32>
    %cst_100 = arith.constant 0.000000e+00 : f32
    %75 = vector.broadcast %cst_100 : f32 to vector<4x16xf32>
    %c0_101 = arith.constant 0 : index
    %c0_102 = arith.constant 0 : index
    %76 = vector.load %arg20[%c0_101, %c0_102] : memref<18x16xf32, #tpu.memory_space<vmem>>, vector<4x16xf32>
    tpu.vector_store %arg20[%c0_101, %c0_102], %75 {strides = array<i32>} : memref<18x16xf32, #tpu.memory_space<vmem>>, vector<4x16xf32>,
    %cst_103 = arith.constant 0.000000e+00 : f32
    %77 = vector.broadcast %cst_103 : f32 to vector<4x16xf32>
    %c14 = arith.constant 14 : index
    %c0_104 = arith.constant 0 : index
    %78 = vector.load %arg20[%c14, %c0_104] : memref<18x16xf32, #tpu.memory_space<vmem>>, vector<4x16xf32>
    tpu.vector_store %arg20[%c14, %c0_104], %77 {strides = array<i32>} : memref<18x16xf32, #tpu.memory_space<vmem>>, vector<4x16xf32>,
    %c4_105 = arith.constant 4 : index
    %c0_106 = arith.constant 0 : index
    %79 = vector.load %arg20[%c4_105, %c0_106] : memref<18x16xf32, #tpu.memory_space<vmem>>, vector<10x16xf32>
    tpu.vector_store %arg20[%c4_105, %c0_106], %74 {strides = array<i32>} : memref<18x16xf32, #tpu.memory_space<vmem>>, vector<10x16xf32>,
    %c0_107 = arith.constant 0 : index
    %c0_108 = arith.constant 0 : index
    %80 = vector.load %arg20[%c0_107, %c0_108] : memref<18x16xf32, #tpu.memory_space<vmem>>, vector<11x16xf32>
    %c0_109 = arith.constant 0 : index
    %c0_110 = arith.constant 0 : index
    %81 = vector.load %arg21[%c0_109, %c0_110] : memref<11x128xf32, #tpu.memory_space<vmem>>, vector<11x16xf32>
    tpu.vector_store %arg21[%c0_109, %c0_110], %80 {strides = array<i32>} : memref<11x128xf32, #tpu.memory_space<vmem>>, vector<11x16xf32>,
    %c1_111 = arith.constant 1 : index
    %c0_112 = arith.constant 0 : index
    %82 = vector.load %arg20[%c1_111, %c0_112] : memref<18x16xf32, #tpu.memory_space<vmem>>, vector<11x16xf32>
    %c0_113 = arith.constant 0 : index
    %c16_114 = arith.constant 16 : index
    %83 = vector.load %arg21[%c0_113, %c16_114] : memref<11x128xf32, #tpu.memory_space<vmem>>, vector<11x16xf32>
    tpu.vector_store %arg21[%c0_113, %c16_114], %82 {strides = array<i32>} : memref<11x128xf32, #tpu.memory_space<vmem>>, vector<11x16xf32>,
    %c2_115 = arith.constant 2 : index
    %c0_116 = arith.constant 0 : index
    %84 = vector.load %arg20[%c2_115, %c0_116] : memref<18x16xf32, #tpu.memory_space<vmem>>, vector<11x16xf32>
    %c0_117 = arith.constant 0 : index
    %c32_118 = arith.constant 32 : index
    %85 = vector.load %arg21[%c0_117, %c32_118] : memref<11x128xf32, #tpu.memory_space<vmem>>, vector<11x16xf32>
    tpu.vector_store %arg21[%c0_117, %c32_118], %84 {strides = array<i32>} : memref<11x128xf32, #tpu.memory_space<vmem>>, vector<11x16xf32>,
    %c3_119 = arith.constant 3 : index
    %c0_120 = arith.constant 0 : index
    %86 = vector.load %arg20[%c3_119, %c0_120] : memref<18x16xf32, #tpu.memory_space<vmem>>, vector<11x16xf32>
    %c0_121 = arith.constant 0 : index
    %c48_122 = arith.constant 48 : index
    %87 = vector.load %arg21[%c0_121, %c48_122] : memref<11x128xf32, #tpu.memory_space<vmem>>, vector<11x16xf32>
    tpu.vector_store %arg21[%c0_121, %c48_122], %86 {strides = array<i32>} : memref<11x128xf32, #tpu.memory_space<vmem>>, vector<11x16xf32>,
    %c4_123 = arith.constant 4 : index
    %c0_124 = arith.constant 0 : index
    %88 = vector.load %arg20[%c4_123, %c0_124] : memref<18x16xf32, #tpu.memory_space<vmem>>, vector<11x16xf32>
    %c0_125 = arith.constant 0 : index
    %c64 = arith.constant 64 : index
    %89 = vector.load %arg21[%c0_125, %c64] : memref<11x128xf32, #tpu.memory_space<vmem>>, vector<11x16xf32>
    tpu.vector_store %arg21[%c0_125, %c64], %88 {strides = array<i32>} : memref<11x128xf32, #tpu.memory_space<vmem>>, vector<11x16xf32>,
    %c5_126 = arith.constant 5 : index
    %c0_127 = arith.constant 0 : index
    %90 = vector.load %arg20[%c5_126, %c0_127] : memref<18x16xf32, #tpu.memory_space<vmem>>, vector<11x16xf32>
    %c0_128 = arith.constant 0 : index
    %c80 = arith.constant 80 : index
    %91 = vector.load %arg21[%c0_128, %c80] : memref<11x128xf32, #tpu.memory_space<vmem>>, vector<11x16xf32>
    tpu.vector_store %arg21[%c0_128, %c80], %90 {strides = array<i32>} : memref<11x128xf32, #tpu.memory_space<vmem>>, vector<11x16xf32>,
    %c6_129 = arith.constant 6 : index
    %c0_130 = arith.constant 0 : index
    %92 = vector.load %arg20[%c6_129, %c0_130] : memref<18x16xf32, #tpu.memory_space<vmem>>, vector<11x16xf32>
    %c0_131 = arith.constant 0 : index
    %c96 = arith.constant 96 : index
    %93 = vector.load %arg21[%c0_131, %c96] : memref<11x128xf32, #tpu.memory_space<vmem>>, vector<11x16xf32>
    tpu.vector_store %arg21[%c0_131, %c96], %92 {strides = array<i32>} : memref<11x128xf32, #tpu.memory_space<vmem>>, vector<11x16xf32>,
    %c7_132 = arith.constant 7 : index
    %c0_133 = arith.constant 0 : index
    %94 = vector.load %arg20[%c7_132, %c0_133] : memref<18x16xf32, #tpu.memory_space<vmem>>, vector<11x16xf32>
    %c0_134 = arith.constant 0 : index
    %c112 = arith.constant 112 : index
    %95 = vector.load %arg21[%c0_134, %c112] : memref<11x128xf32, #tpu.memory_space<vmem>>, vector<11x16xf32>
    tpu.vector_store %arg21[%c0_134, %c112], %94 {strides = array<i32>} : memref<11x128xf32, #tpu.memory_space<vmem>>, vector<11x16xf32>,
    %c0_135 = arith.constant 0 : index
    %c0_136 = arith.constant 0 : index
    %96 = vector.load %arg21[%c0_135, %c0_136] : memref<11x128xf32, #tpu.memory_space<vmem>>, vector<11x128xf32>
    %cst_137 = arith.constant dense<0.000000e+00> : vector<11x16xf32>
    %97 = tpu.matmul %96, %8, %cst_137 {dimension_numbers = #tpu.dot_dimension_numbers<[1], [0], [0], [1], [0, 0, 1, 1], [], []>} : vector<11x128xf32>, vector<128x16xf32>, vector<11x16xf32> -> vector<11x16xf32>
    %98 = vector.broadcast %9 : vector<1x16xf32> to vector<11x16xf32>
    %99 = arith.addf %97, %98 : vector<11x16xf32>
    %cst_138 = arith.constant 0.000000e+00 : f32
    %100 = vector.broadcast %cst_138 : f32 to vector<11x16xf32>
    %101 = arith.maximumf %99, %100 : vector<11x16xf32>
    %cst_139 = arith.constant dense<0.000000e+00> : vector<6x16xf32>
    %102 = tpu.matmul %10, %101, %cst_139 {dimension_numbers = #tpu.dot_dimension_numbers<[1], [0], [0], [1], [0, 0, 1, 1], [], []>} : vector<6x11xf32>, vector<11x16xf32>, vector<6x16xf32> -> vector<6x16xf32>
    %cst_140 = arith.constant dense<0.000000e+00> : vector<6x16xf32>
    %103 = tpu.matmul %11, %101, %cst_140 {dimension_numbers = #tpu.dot_dimension_numbers<[1], [0], [0], [1], [0, 0, 1, 1], [], []>} : vector<6x11xf32>, vector<11x16xf32>, vector<6x16xf32> -> vector<6x16xf32>
    %104 = arith.maximumf %102, %103 : vector<6x16xf32>
    %cst_141 = arith.constant dense<0.000000e+00> : vector<4x16xf32>
    %105 = tpu.matmul %12, %104, %cst_141 {dimension_numbers = #tpu.dot_dimension_numbers<[1], [0], [0], [1], [0, 0, 1, 1], [], []>} : vector<4x6xf32>, vector<6x16xf32>, vector<4x16xf32> -> vector<4x16xf32>
    %c0_142 = arith.constant 0 : index
    %c0_143 = arith.constant 0 : index
    %c0_144 = arith.constant 0 : index
    %106 = vector.load %arg15[%c0_142, %c0_143, %c0_144] : memref<1x4x16xf32, #tpu.memory_space<vmem>>, vector<1x4x16xf32>
    %107 = vector.shape_cast %106 : vector<1x4x16xf32> to vector<4x16xf32>
    %108 = vector.shape_cast %105 : vector<4x16xf32> to vector<1x4x16xf32>
    tpu.vector_store %arg15[%c0_142, %c0_143, %c0_144], %108 {strides = array<i32>} : memref<1x4x16xf32, #tpu.memory_space<vmem>>, vector<1x4x16xf32>,
    return
  }
  func.func @transform_0(%arg0: i32) -> (i32, i32, i32) {
    %c0_i32 = arith.constant 0 : i32
    %c0_i32_0 = arith.constant 0 : i32
    %c0_i32_1 = arith.constant 0 : i32
    return %arg0, %c0_i32, %c0_i32_0 : i32, i32, i32
  }
  func.func @transform_1(%arg0: i32) -> (i32, i32) {
    %c0_i32 = arith.constant 0 : i32
    %c0_i32_0 = arith.constant 0 : i32
    %c0_i32_1 = arith.constant 0 : i32
    return %c0_i32, %c0_i32_0 : i32, i32
  }
  func.func @transform_2(%arg0: i32) -> (i32, i32) {
    %c0_i32 = arith.constant 0 : i32
    %c0_i32_0 = arith.constant 0 : i32
    %c0_i32_1 = arith.constant 0 : i32
    return %c0_i32, %c0_i32_0 : i32, i32
  }
  func.func @transform_3(%arg0: i32) -> (i32, i32) {
    %c0_i32 = arith.constant 0 : i32
    %c0_i32_0 = arith.constant 0 : i32
    %c0_i32_1 = arith.constant 0 : i32
    return %c0_i32, %c0_i32_0 : i32, i32
  }
  func.func @transform_4(%arg0: i32) -> (i32, i32) {
    %c0_i32 = arith.constant 0 : i32
    %c0_i32_0 = arith.constant 0 : i32
    %c0_i32_1 = arith.constant 0 : i32
    return %c0_i32, %c0_i32_0 : i32, i32
  }
  func.func @transform_5(%arg0: i32) -> (i32, i32) {
    %c0_i32 = arith.constant 0 : i32
    %c0_i32_0 = arith.constant 0 : i32
    %c0_i32_1 = arith.constant 0 : i32
    return %c0_i32, %c0_i32_0 : i32, i32
  }
  func.func @transform_6(%arg0: i32) -> (i32, i32) {
    %c0_i32 = arith.constant 0 : i32
    %c0_i32_0 = arith.constant 0 : i32
    %c0_i32_1 = arith.constant 0 : i32
    return %c0_i32, %c0_i32_0 : i32, i32
  }
  func.func @transform_7(%arg0: i32) -> (i32, i32) {
    %c0_i32 = arith.constant 0 : i32
    %c0_i32_0 = arith.constant 0 : i32
    %c0_i32_1 = arith.constant 0 : i32
    return %c0_i32, %c0_i32_0 : i32, i32
  }
  func.func @transform_8(%arg0: i32) -> (i32, i32) {
    %c0_i32 = arith.constant 0 : i32
    %c0_i32_0 = arith.constant 0 : i32
    %c0_i32_1 = arith.constant 0 : i32
    return %c0_i32, %c0_i32_0 : i32, i32
  }
  func.func @transform_9(%arg0: i32) -> (i32, i32) {
    %c0_i32 = arith.constant 0 : i32
    %c0_i32_0 = arith.constant 0 : i32
    %c0_i32_1 = arith.constant 0 : i32
    return %c0_i32, %c0_i32_0 : i32, i32
  }
  func.func @transform_10(%arg0: i32) -> (i32, i32) {
    %c0_i32 = arith.constant 0 : i32
    %c0_i32_0 = arith.constant 0 : i32
    %c0_i32_1 = arith.constant 0 : i32
    return %c0_i32, %c0_i32_0 : i32, i32
  }
  func.func @transform_11(%arg0: i32) -> (i32, i32) {
    %c0_i32 = arith.constant 0 : i32
    %c0_i32_0 = arith.constant 0 : i32
    %c0_i32_1 = arith.constant 0 : i32
    return %c0_i32, %c0_i32_0 : i32, i32
  }
  func.func @transform_12(%arg0: i32) -> (i32, i32) {
    %c0_i32 = arith.constant 0 : i32
    %c0_i32_0 = arith.constant 0 : i32
    %c0_i32_1 = arith.constant 0 : i32
    return %c0_i32, %c0_i32_0 : i32, i32
  }
  func.func @transform_13(%arg0: i32) -> (i32, i32) {
    %c0_i32 = arith.constant 0 : i32
    %c0_i32_0 = arith.constant 0 : i32
    %c0_i32_1 = arith.constant 0 : i32
    return %c0_i32, %c0_i32_0 : i32, i32
  }
  func.func @transform_14(%arg0: i32) -> (i32, i32, i32) {
    %c0_i32 = arith.constant 0 : i32
    %c0_i32_0 = arith.constant 0 : i32
    %c0_i32_1 = arith.constant 0 : i32
    return %arg0, %c0_i32, %c0_i32_0 : i32, i32, i32
  }
}

</mosaic_0001>

<bundles_post_ra>
// kernel: _lambda_.1
= control target key start
LH: loop header
LB: loop body
LE: loop exit
PB: predicated region body
PF: predicated region fallthrough
CT: control target
= control target key end

     0   :  { %s1604_s29 = smov 0   ;;  %s1889_s0 = inlined_call_operand.vmem [shape: f32[2,32,4], index: 0, kind: input, shape index: {}]   ;;  %s1890_s1 = inlined_call_operand.vmem [shape: f32[32,8], index: 1, kind: input, shape index: {}]   ;;  %s1891_s2 = inlined_call_operand.vmem [shape: f32[1,8], index: 2, kind: input, shape index: {}]   ;;  %s1892_s3 = inlined_call_operand.vmem [shape: f32[17,33], index: 3, kind: input, shape index: {}]   ;;  %s1893_s4 = inlined_call_operand.vmem [shape: f32[17,33], index: 4, kind: input, shape index: {}]   ;;  %s1894_s5 = inlined_call_operand.vmem [shape: f32[64,16], index: 5, kind: input, shape index: {}]   ;;  %s1895_s6 = inlined_call_operand.vmem [shape: f32[1,16], index: 6, kind: input, shape index: {}]   ;;  %s1896_s7 = inlined_call_operand.vmem [shape: f32[10,18], index: 7, kind: input, shape index: {}]   ;;  %s1897_s8 = inlined_call_operand.vmem [shape: f32[10,18], index: 8, kind: input, shape index: {}]   ;;  %s1898_s9 = inlined_call_operand.vmem [shape: f32[128,16], index: 9, kind: input, shape index: {}]   ;;  %s1899_s10 = inlined_call_operand.vmem [shape: f32[1,16], index: 10, kind: input, shape index: {}]   ;;  %s1900_s11 = inlined_call_operand.vmem [shape: f32[6,11], index: 11, kind: input, shape index: {}]   ;;  %s1901_s12 = inlined_call_operand.vmem [shape: f32[6,11], index: 12, kind: input, shape index: {}]   ;;  %s1902_s13 = inlined_call_operand.vmem [shape: f32[4,6], index: 13, kind: input, shape index: {}]   ;;  %s1903_s14 = inlined_call_operand.vmem [shape: f32[2,4,16], index: 14, kind: output, shape index: {}]  }
   0x1 LB: > { %s1435_s30 = sadd.s32 4294967295, %s1511_s29   ;;  %p1439_p0 = scmp.ge.s32.totalorder %s1511_s29, 1  ;;  %s1511_s29 = sphi %s1604_s29, %s24_s29  }
   0x2   : > { %p412_p1 = scmp.lt.s32.totalorder %s1511_s29, 3 }
   0x4   : > { %p413_p2 = pnand %p1439_p0, %p412_p1 }
   0x5   : > { %p457_p3 = scmp.lt.s32.totalorder (!%p413_p2), %s1435_s30, 1  ;;  %s1514_s19 = smov (!%p413_p2), 4  }
   0x6   : > { %416 = sbr.rel (%p413_p2) target bundleno = 1529 (0x5f9), region = 76  ;;  %s1515_s20 = smov (!%p413_p2), 12  }
   0x7   : > { %s1516_s21 = smov (!%p413_p2), 20   ;;  %s1517_s22 = smov (!%p413_p2), 8  }
   0x8   : > { %s1518_s23 = smov (!%p413_p2), 16   ;;  %s1519_s24 = smov (!%p413_p2), 24  }
   0x9   : > { %s1520_s25 = smov (!%p413_p2), 28   ;;  %s1521_s26 = smov (!%p413_p2), 48  }
   0xa   : > { %s1522_s27 = smov (!%p413_p2), 40   ;;  %s1523_s28 = smov (!%p413_p2), 32  }
   0xb   : > { %vm514_vm0 = vcmask 27648   ;;  %v1513_v0 = vmov 0.0   ;;  %s1905_s30 = smov (!%p457_p3, %s1435_s30), 1  ;;  %vm517_vm1 = vcmask 31744   ;;  %v469_v43 = vld [vmem:[%s1890_s1 + $0x18] sm:$0xff]  ;;  %v468_v45 = vld [vmem:[%s1890_s1 + $0x10] sm:$0xff] }
   0xc   : > { %515 = vst.msk [vmem:[#allocation2] sm:$0xf] %vm514_vm0, %v1513_v0  ;;  %s1473_s15 = sshll.u32 %s1905_s30, 5  ;;  %793 = vmatpush.msra.mxu0 %v469_v43  ;;  %1474 = vmatpush.msra.mxu2 %v469_v43  ;;  %v467_v46 = vld [vmem:[%s1890_s1 + $0x8] sm:$0xff]  ;;  %v466_v47 = vld [vmem:[%s1890_s1] sm:$0xff]  ;;  %vm558_vm2 = vcmask 64544  }
   0xd   : > { %516 = vst.msk [vmem:[#allocation2 + $0x24] sm:$0xf] %vm514_vm0, %v1513_v0  ;;  %s461_s18 = scalar_lea.vmem %s1889_s0, %s1473_s15  ;;  %vm531_vm3 = vcmask 24576   ;;  %vm590_vm4 = vcmask 97344   ;;  %vm622_vm5 = vcmask 130144   ;;  %vm654_vm6 = vcmask 162944  }
   0xe   : > { %v510_v1 = vld [vmem:[%s461_s18] sm:$0xff]  ;;  %v511_v2 = vld [vmem:[%s461_s18 + $0x8] sm:$0xff]  ;;  %v512_v3 = vld [vmem:[%s461_s18 + $0x10] sm:$0xff]  ;;  %794 = vmatpush.msra.mxu0 %v468_v45  ;;  %1475 = vmatpush.msra.mxu2 %v468_v45  ;;  %vm686_vm7 = vcmask 195744   ;;  %vm718_vm8 = vcmask 228544   ;;  %vm750_vm9 = vcmask 261344  }
   0xf   : > { %518 = vst.msk [vmem:[#allocation2 + $0x4] sm:$0xff] %vm517_vm1, %v510_v1  ;;  %v513_v7 = vld [vmem:[%s461_s18 + $0x18] sm:$0xff]  ;;  %vm765_vm10 = vcmask 261120   ;;  %vm563_vm11 = vcmask 57376   ;;  %vm595_vm12 = vcmask 90176   ;;  %vm627_vm13 = vcmask 122976  }
  0x10   : > { %519 = vst.msk [vmem:[#allocation2 + $0xc] sm:$0xff] %vm517_vm1, %v511_v2  ;;  %795 = vmatpush.msra.mxu0 %v467_v46  ;;  %1476 = vmatpush.msra.mxu2 %v467_v46  ;;  %vm659_vm14 = vcmask 155776   ;;  %vm691_vm15 = vcmask 188576   ;;  %vm723_vm0 = vcmask 221376   ;;  %v471_v43 = vld [vmem:[%s1892_s3] sm:$0xff]  ;;  %v472_v45 = vld [vmem:[%s1892_s3 + $0x8] sm:$0xff] }
  0x11   : > { %520 = vst.msk [vmem:[#allocation2 + $0x14] sm:$0xff] %vm517_vm1, %v512_v3  ;;  %v476_v46 = vld [vmem:[%s1893_s4 + $0x10] sm:$0x1]  ;;  %s1524_s15 = smov 56  }
  0x12   : > { %521 = vst.msk [vmem:[#allocation2 + $0x1c] sm:$0xff] %vm517_vm1, %v513_v7  ;;  %796 = vmatpush.msra.mxu0 %v466_v47  ;;  %1477 = vmatpush.msra.mxu2 %v466_v47  ;;  %v473_v47 = vld [vmem:[%s1892_s3 + $0x10] sm:$0x1] }
  0x14   : > { %v633_v26 = vld [vmem:[#allocation2 + $0x24] sm:$0x1]  ;;  %v665_v28 = vld [vmem:[#allocation2 + $0x25] sm:$0x1]  ;;  %v697_v30 = vld [vmem:[#allocation2 + $0x26] sm:$0x1] }
  0x15   : > { %v729_v32 = vld [vmem:[#allocation2 + $0x27] sm:$0x1] }
  0x16   : > { %v533_v4 = vld [vmem:[#allocation2 + $0x1] sm:$0xff] }
  0x17   : > { %v597_v5 = vld [vmem:[#allocation2 + $0x3] sm:$0xff]  ;;  %543 = vrot.lane.b32.xlu0 %v533_v4, %s1514_s19  ;;  %v598_v14 = vld [vmem:[#allocation2 + $0xb] sm:$0xff] }
  0x18   : > { %607 = vrot.lane.b32.xlu1 %v597_v5, %s1515_s20  ;;  %v661_v6 = vld [vmem:[#allocation2 + $0x5] sm:$0xff]  ;;  %v662_v16 = vld [vmem:[#allocation2 + $0xd] sm:$0xff] }
  0x19   : > { %671 = vrot.lane.b32.xlu2 %v661_v6, %s1516_s21  ;;  %v565_v8 = vld [vmem:[#allocation2 + $0x2] sm:$0xff]  ;;  %v566_v13 = vld [vmem:[#allocation2 + $0xa] sm:$0xff]  ;;  %v537_v20 = vld [vmem:[#allocation2 + $0x21] sm:$0x1] }
  0x1a   : > { %v629_v9 = vld [vmem:[#allocation2 + $0x4] sm:$0xff]  ;;  %v630_v15 = vld [vmem:[#allocation2 + $0xc] sm:$0xff]  ;;  %v569_v22 = vld [vmem:[#allocation2 + $0x22] sm:$0x1] }
  0x1b   : > { %v693_v10 = vld [vmem:[#allocation2 + $0x6] sm:$0xff]  ;;  %v694_v17 = vld [vmem:[#allocation2 + $0xe] sm:$0xff]  ;;  %v601_v24 = vld [vmem:[#allocation2 + $0x23] sm:$0x1] }
  0x1c   : > { %v725_v11 = vld [vmem:[#allocation2 + $0x7] sm:$0xff]  ;;  %v726_v18 = vld [vmem:[#allocation2 + $0xf] sm:$0xff]  ;;  %v727_v31 = vld [vmem:[#allocation2 + $0x17] sm:$0xff] }
  0x1d   : > { %v534_v12 = vld [vmem:[#allocation2 + $0x9] sm:$0xff]  ;;  %v535_v19 = vld [vmem:[#allocation2 + $0x11] sm:$0xff]  ;;  %v536_v33 = vld [vmem:[#allocation2 + $0x19] sm:$0xff] }
  0x1e   : > { %v567_v21 = vld [vmem:[#allocation2 + $0x12] sm:$0xff]  ;;  %v568_v34 = vld [vmem:[#allocation2 + $0x1a] sm:$0xff]  ;;  %v523_v42 = vld [vmem:[#allocation2 + $0x8] sm:$0xff] }
  0x1f   : > { %575 = vrot.lane.b32.xlu0 %v565_v8, %s1517_s22  ;;  %v599_v23 = vld [vmem:[#allocation2 + $0x13] sm:$0xff]  ;;  %v600_v35 = vld [vmem:[#allocation2 + $0x1b] sm:$0xff]  ;;  %528 = vst.msk [vmem:[#allocation3 + $0x8] sm:$0xff] %vm517_vm1, %v523_v42 }
  0x20   : > { %639 = vrot.lane.b32.xlu1 %v629_v9, %s1518_s23  ;;  %v631_v25 = vld [vmem:[#allocation2 + $0x14] sm:$0xff]  ;;  %v632_v36 = vld [vmem:[#allocation2 + $0x1c] sm:$0xff] }
  0x21   : > { %703 = vrot.lane.b32.xlu2 %v693_v10, %s1519_s24  ;;  %v663_v27 = vld [vmem:[#allocation2 + $0x15] sm:$0xff]  ;;  %v664_v37 = vld [vmem:[#allocation2 + $0x1d] sm:$0xff] }
  0x22   : > { %v695_v29 = vld [vmem:[#allocation2 + $0x16] sm:$0xff]  ;;  %v522_v38 = vld [vmem:[#allocation2] sm:$0xff] }
  0x23   : > { %527 = vst.msk [vmem:[#allocation3] sm:$0xff] %vm517_vm1, %v522_v38  ;;  %v696_v39 = vld [vmem:[#allocation2 + $0x1e] sm:$0xff]  ;;  %v524_v52 = vld [vmem:[#allocation2 + $0x10] sm:$0xff] }
  0x24   : > { %v728_v40 = vld [vmem:[#allocation2 + $0x1f] sm:$0xff]  ;;  %529 = vst.msk [vmem:[#allocation3 + $0x10] sm:$0xff] %vm517_vm1, %v524_v52 }
  0x25   : > { %v526_v53 = vld [vmem:[#allocation2 + $0x20] sm:$0x1]  ;;  %v525_v6 = vld [vmem:[#allocation2 + $0x18] sm:$0xff] }
  0x26   : > { %532 = vst.msk [vmem:[#allocation3 + $0x20] sm:$0x1] %vm531_vm3, %v526_v53  ;;  %v474_v42 = vld [vmem:[%s1893_s4] sm:$0xff]  ;;  %vm818_vm3 = vcmask 269312  }
  0x27   : > { %735 = vrot.lane.b32.xlu0 %v725_v11, %s1520_s25  ;;  %530 = vst.msk [vmem:[#allocation3 + $0x18] sm:$0xff] %vm517_vm1, %v525_v6  ;;  %vm755_vm1 = vcmask 254176  }
  0x28   : > { %545 = vrot.lane.b32.xlu1 %v534_v12, %s1514_s19 }
  0x29   : > { %577 = vrot.lane.b32.xlu2 %v566_v13, %s1517_s22 }
  0x2f   : > { %609 = vrot.lane.b32.xlu0 %v598_v14, %s1515_s20 }
  0x30   : > { %641 = vrot.lane.b32.xlu1 %v630_v15, %s1518_s23 }
  0x31   : > { %673 = vrot.lane.b32.xlu2 %v662_v16, %s1516_s21 }
  0x37   : > { %705 = vrot.lane.b32.xlu0 %v694_v17, %s1519_s24 }
  0x38   : > { %737 = vrot.lane.b32.xlu1 %v726_v18, %s1520_s25 }
  0x39   : > { %547 = vrot.lane.b32.xlu2 %v535_v19, %s1514_s19 }
  0x3f   : > { %551 = vrot.lane.b32.xlu0 %v537_v20, %s1514_s19 }
  0x40   : > { %579 = vrot.lane.b32.xlu1 %v567_v21, %s1517_s22 }
  0x41   : > { %583 = vrot.lane.b32.xlu2 %v569_v22, %s1517_s22 }
  0x47   : > { %611 = vrot.lane.b32.xlu0 %v599_v23, %s1515_s20 }
  0x48   : > { %615 = vrot.lane.b32.xlu1 %v601_v24, %s1515_s20 }
  0x49   : > { %643 = vrot.lane.b32.xlu2 %v631_v25, %s1518_s23 }
  0x4f   : > { %647 = vrot.lane.b32.xlu0 %v633_v26, %s1518_s23 }
  0x50   : > { %675 = vrot.lane.b32.xlu1 %v663_v27, %s1516_s21 }
  0x51   : > { %679 = vrot.lane.b32.xlu2 %v665_v28, %s1516_s21  ;;  %v1502_v28 = vld [vmem:[%s1891_s2] ss:$0 sm:$0xff] }
  0x57   : > { %707 = vrot.lane.b32.xlu0 %v695_v29, %s1519_s24 }
  0x58   : > { %711 = vrot.lane.b32.xlu1 %v697_v30, %s1519_s24 }
  0x59   : > { %739 = vrot.lane.b32.xlu2 %v727_v31, %s1520_s25 }
  0x5f   : > { %743 = vrot.lane.b32.xlu0 %v729_v32, %s1520_s25 }
  0x60   : > { %549 = vrot.lane.b32.xlu1 %v536_v33, %s1514_s19  ;;  %s1526_s19 = smov 64  }
  0x61   : > { %581 = vrot.lane.b32.xlu2 %v568_v34, %s1517_s22 }
  0x67   : > { %613 = vrot.lane.b32.xlu0 %v600_v35, %s1515_s20  ;;  %s1527_s20 = smov 80  }
  0x68   : > { %645 = vrot.lane.b32.xlu1 %v632_v36, %s1518_s23 }
  0x69   : > { %677 = vrot.lane.b32.xlu2 %v664_v37, %s1516_s21  ;;  %s1528_s21 = smov 112  }
  0x6f   : > { %709 = vrot.lane.b32.xlu0 %v696_v39, %s1519_s24 }
  0x70   : > { %741 = vrot.lane.b32.xlu1 %v728_v40, %s1520_s25 }
  0x73   : > { %v672_v41 = vpop.permute.xlu2 %671 }
  0x7b   : > { %v704_v44 = vpop.permute.xlu2 %703 }
  0x83   : > { %v578_v48 = vpop.permute.xlu2 %577 }
  0x89   : > { %v544_v49 = vpop.permute.xlu0 %543 }
  0x8a   : > { %v608_v50 = vpop.permute.xlu1 %607  ;;  %559 = vst.msk [vmem:[#allocation3] sm:$0xff] %vm558_vm2, %v544_v49 }
  0x8b   : > { %v674_v51 = vpop.permute.xlu2 %673 }
  0x91   : > { %v576_v54 = vpop.permute.xlu0 %575 }
  0x92   : > { %v640_v55 = vpop.permute.xlu1 %639  ;;  %591 = vst.msk [vmem:[#allocation3] sm:$0xff] %vm590_vm4, %v576_v54 }
  0x93   : > { %623 = vst.msk [vmem:[#allocation3] sm:$0xff] %vm622_vm5, %v608_v50  ;;  %v548_v56 = vpop.permute.xlu2 %547 }
  0x94   : > { %655 = vst.msk [vmem:[#allocation3] sm:$0xff] %vm654_vm6, %v640_v55 }
  0x95   : > { %687 = vst.msk [vmem:[#allocation3] sm:$0xff] %vm686_vm7, %v672_v41 }
  0x96   : > { %719 = vst.msk [vmem:[#allocation3] sm:$0xff] %vm718_vm8, %v704_v44  ;;  %v475_v44 = vld [vmem:[%s1893_s4 + $0x8] sm:$0xff] }
  0x97   : > { %561 = vst.msk [vmem:[#allocation3 + $0x10] sm:$0xff] %vm558_vm2, %v548_v56 }
  0x99   : > { %v736_v57 = vpop.permute.xlu0 %735 }
  0x9a   : > { %v546_v58 = vpop.permute.xlu1 %545  ;;  %751 = vst.msk [vmem:[#allocation3] sm:$0xff] %vm750_vm9, %v736_v57 }
  0x9b   : > { %560 = vst.msk [vmem:[#allocation3 + $0x8] sm:$0xff] %vm558_vm2, %v546_v58  ;;  %v584_v62 = vpop.permute.xlu2 %583 }
  0x9c   : > { %592 = vst.msk [vmem:[#allocation3 + $0x8] sm:$0xff] %vm590_vm4, %v578_v48 }
  0xa1   : > { %v610_v59 = vpop.permute.xlu0 %609  ;;  %v757_v61 = vld [vmem:[#allocation3] sm:$0xff] }
  0xa2   : > { %v642_v60 = vpop.permute.xlu1 %641  ;;  %624 = vst.msk [vmem:[#allocation3 + $0x8] sm:$0xff] %vm622_vm5, %v610_v59  ;;  %1443 = vmatmul.msk.f32.vlgmr.msra.gmra.mxu0 %vm765_vm10, %v757_v61 }
  0xa3   : > { %656 = vst.msk [vmem:[#allocation3 + $0x8] sm:$0xff] %vm654_vm6, %v642_v60  ;;  %v644_v2 = vpop.permute.xlu2 %643 }
  0xa4   : > { %688 = vst.msk [vmem:[#allocation3 + $0x8] sm:$0xff] %vm686_vm7, %v674_v51 }
  0xa9   : > { %v706_v63 = vpop.permute.xlu0 %705 }
  0xaa   : > { %v738_v1 = vpop.permute.xlu1 %737  ;;  %720 = vst.msk [vmem:[#allocation3 + $0x8] sm:$0xff] %vm718_vm8, %v706_v63 }
  0xab   : > { %752 = vst.msk [vmem:[#allocation3 + $0x8] sm:$0xff] %vm750_vm9, %v738_v1  ;;  %v680_v9 = vpop.permute.xlu2 %679 }
  0xb1   : > { %v552_v3 = vpop.permute.xlu0 %551 }
  0xb2   : > { %v580_v4 = vpop.permute.xlu1 %579  ;;  %564 = vst.msk [vmem:[#allocation3 + $0x20] sm:$0x1] %vm563_vm11, %v552_v3  ;;  %v758_v5 = vld [vmem:[#allocation3 + $0x8] sm:$0xff]  ;;  %vm986_vm11 = vcmask 326912  }
  0xb3   : > { %593 = vst.msk [vmem:[#allocation3 + $0x10] sm:$0xff] %vm590_vm4, %v580_v4  ;;  %1444 = vmatmul.msk.f32.gmra.mxu0 %vm765_vm10, %v758_v5  ;;  %v740_v12 = vpop.permute.xlu2 %739 }
  0xb4   : > { %596 = vst.msk [vmem:[#allocation3 + $0x20] sm:$0x1] %vm595_vm12, %v584_v62  ;;  %vm1006_vm12 = vcmask 392512  }
  0xb9   : > { %v612_v7 = vpop.permute.xlu0 %611 }
  0xba   : > { %v616_v8 = vpop.permute.xlu1 %615  ;;  %625 = vst.msk [vmem:[#allocation3 + $0x10] sm:$0xff] %vm622_vm5, %v612_v7 }
  0xbb   : > { %628 = vst.msk [vmem:[#allocation3 + $0x20] sm:$0x1] %vm627_vm13, %v616_v8  ;;  %v582_v15 = vpop.permute.xlu2 %581  ;;  %vm1026_vm13 = vcmask 458112  }
  0xbc   : > { %657 = vst.msk [vmem:[#allocation3 + $0x10] sm:$0xff] %vm654_vm6, %v644_v2 }
  0xc1   : > { %v648_v10 = vpop.permute.xlu0 %647 }
  0xc2   : > { %v676_v11 = vpop.permute.xlu1 %675  ;;  %660 = vst.msk [vmem:[#allocation3 + $0x20] sm:$0x1] %vm659_vm14, %v648_v10  ;;  %vm1046_vm14 = vcmask 523712  }
  0xc3   : > { %689 = vst.msk [vmem:[#allocation3 + $0x10] sm:$0xff] %vm686_vm7, %v676_v11  ;;  %v678_v19 = vpop.permute.xlu2 %677 }
  0xc4   : > { %692 = vst.msk [vmem:[#allocation3 + $0x20] sm:$0x1] %vm691_vm15, %v680_v9  ;;  %vm1057_vm15 = vcmask 523264  }
  0xc9   : > { %v708_v13 = vpop.permute.xlu0 %707 }
  0xca   : > { %v712_v14 = vpop.permute.xlu1 %711  ;;  %721 = vst.msk [vmem:[#allocation3 + $0x10] sm:$0xff] %vm718_vm8, %v708_v13 }
  0xcb   : > { %724 = vst.msk [vmem:[#allocation3 + $0x20] sm:$0x1] %vm723_vm0, %v712_v14  ;;  %vm929_vm0 = vcmask 123968  }
  0xcc   : > { %753 = vst.msk [vmem:[#allocation3 + $0x10] sm:$0xff] %vm750_vm9, %v740_v12 }
  0xd1   : > { %v744_v16 = vpop.permute.xlu0 %743 }
  0xd2   : > { %v550_v17 = vpop.permute.xlu1 %549  ;;  %756 = vst.msk [vmem:[#allocation3 + $0x20] sm:$0x1] %vm755_vm1, %v744_v16  ;;  %vm949_vm1 = vcmask 189568  }
  0xd3   : > { %562 = vst.msk [vmem:[#allocation3 + $0x18] sm:$0xff] %vm558_vm2, %v550_v17  ;;  %v759_v18 = vld [vmem:[#allocation3 + $0x10] sm:$0xff]  ;;  %vm828_vm2 = vcmask 1040384  }
  0xd4   : > { %594 = vst.msk [vmem:[#allocation3 + $0x18] sm:$0xff] %vm590_vm4, %v582_v15  ;;  %1445 = vmatmul.msk.f32.gmra.mxu0 %vm765_vm10, %v759_v18  ;;  %vm896_vm4 = vcmask 60416   ;;  %v484_v18 = vld [vmem:[%s1894_s5 + $0x38] sm:$0xff] }
  0xd5   : > { %897 = vst.msk [vmem:[#allocation4] sm:$0xf] %vm896_vm4, %v1513_v0  ;;  %1075 = vmatpush.msra.mxu3 %v484_v18 }
  0xd6   : > { %898 = vst.msk [vmem:[#allocation4 + $0x15] sm:$0xf] %vm896_vm4, %v1513_v0  ;;  %vm1009_vm4 = vcmask 386368  }
  0xd9   : > { %v614_v20 = vpop.permute.xlu0 %613  ;;  %v761_v22 = vld [vmem:[#allocation3 + $0x20] sm:$0x1] }
  0xda   : > { %v646_v21 = vpop.permute.xlu1 %645  ;;  %626 = vst.msk [vmem:[#allocation3 + $0x18] sm:$0xff] %vm622_vm5, %v614_v20  ;;  %1447 = vmatmul.msk.f32.vlgmr.msra.gmra.mxu2 %vm765_vm10, %v761_v22  ;;  %vm899_vm5 = vcmask 64512   ;;  %v482_v20 = vld [vmem:[%s1894_s5 + $0x28] sm:$0xff]  ;;  %v481_v22 = vld [vmem:[%s1894_s5 + $0x20] sm:$0xff] }
  0xdb   : > { %658 = vst.msk [vmem:[#allocation3 + $0x18] sm:$0xff] %vm654_vm6, %v646_v21  ;;  %vm902_vm6 = vcmask 57344  }
  0xdc   : > { %690 = vst.msk [vmem:[#allocation3 + $0x18] sm:$0xff] %vm686_vm7, %v678_v19  ;;  %vm909_vm7 = vcmask 58368   ;;  %v483_v19 = vld [vmem:[%s1894_s5 + $0x30] sm:$0xff] }
  0xdd   : > { %v1013_v15 = vld [vmem:[#allocation4 + $0x16] sm:$0x3]  ;;  %1076 = vmatpush.msra.mxu3 %v483_v19 }
  0xde   : > { %v1033_v16 = vld [vmem:[#allocation4 + $0x17] sm:$0x3]  ;;  %v993_v17 = vld [vmem:[#allocation4 + $0x15] sm:$0x3] }
  0xdf   : > { %1077 = vmatpush.msra.mxu3 %v482_v20 }
  0xe1   : > { %v710_v23 = vpop.permute.xlu0 %709  ;;  %1078 = vmatpush.msra.mxu3 %v481_v22  ;;  %v505_v22 = vld [vmem:[%s1898_s9 + $0x78] sm:$0xff] }
  0xe2   : > { %v742_v24 = vpop.permute.xlu1 %741  ;;  %722 = vst.msk [vmem:[#allocation3 + $0x18] sm:$0xff] %vm718_vm8, %v710_v23  ;;  %vm926_vm8 = vcmask 130112   ;;  %v480_v23 = vld [vmem:[%s1894_s5 + $0x18] sm:$0xff]  ;;  %1276 = vmatpush.msrb.mxu0 %v505_v22 }
  0xe3   : > { %754 = vst.msk [vmem:[#allocation3 + $0x18] sm:$0xff] %vm750_vm9, %v742_v24  ;;  %v479_v24 = vld [vmem:[%s1894_s5 + $0x10] sm:$0xff]  ;;  %1079 = vmatpush.msra.mxu3 %v480_v23  ;;  %vm946_vm9 = vcmask 195712  }
  0xe4   : > { %v504_v23 = vld [vmem:[%s1898_s9 + $0x70] sm:$0xff] }
  0xe5   : > { %1080 = vmatpush.msra.mxu3 %v479_v24  ;;  %v503_v24 = vld [vmem:[%s1898_s9 + $0x68] sm:$0xff]  ;;  %1277 = vmatpush.msrb.mxu0 %v504_v23 }
  0xe7   : > { %1278 = vmatpush.msrb.mxu0 %v503_v24 }
  0xea   : > { %v760_v25 = vld [vmem:[#allocation3 + $0x18] sm:$0xff] }
  0xeb   : > { %1446 = vmatmul.msk.f32.gmra.mxu0 %vm765_vm10, %v760_v25  ;;  %v478_v25 = vld [vmem:[%s1894_s5 + $0x8] sm:$0xff]  ;;  %vm966_vm10 = vcmask 261312  }
  0xec   : > { %1081 = vmatpush.msra.mxu3 %v478_v25  ;;  %v502_v25 = vld [vmem:[%s1898_s9 + $0x60] sm:$0xff] }
  0xed   : > { %1279 = vmatpush.msrb.mxu0 %v502_v25 }
 0x11f   : > { %v798_v26 = vpop.f32.mrf.mxu0 }
 0x120   : > { %v799_v38 = vadd.f32 %v1502_v28, %v798_v26  ;;  %v477_v26 = vld [vmem:[%s1894_s5] sm:$0xff] }
 0x121   : > { %1082 = vmatpush.msra.mxu3 %v477_v26  ;;  %v501_v26 = vld [vmem:[%s1898_s9 + $0x58] sm:$0xff] }
 0x122   : > { %v813_v41 = vmax.f32 %v799_v38, 0.0  ;;  %1280 = vmatpush.msrb.mxu0 %v501_v26 }
 0x130   : > { %v801_v27 = vpop.f32.mrf.mxu0 }
 0x131   : > { %v802_v36 = vadd.f32 %v1502_v28, %v801_v27 }
 0x133   : > { %v814_v40 = vmax.f32 %v802_v36, 0.0 }
 0x151   : > { %v804_v31 = vpop.f32.mrf.mxu0 }
 0x152   : > { %v805_v34 = vadd.f32 %v1502_v28, %v804_v31 }
 0x154   : > { %v815_v39 = vmax.f32 %v805_v34, 0.0 }
 0x15d   : > { %v810_v29 = vpop.f32.mrf.mxu2 }
 0x15e   : > { %v811_v30 = vadd.f32 %v1502_v28, %v810_v29 }
 0x160   : > { %v817_v32 = vmax.f32 %v811_v30, 0.0 }
 0x162   : > { %1448 = vmatpush.msk.msra.mxu1 %vm828_vm2, %v817_v32  ;;  %1452 = vmatpush.msk.msrb.mxu2 %vm828_vm2, %v817_v32  ;;  %vm969_vm2 = vcmask 255168  }
 0x168   : > { %v807_v33 = vpop.f32.mrf.mxu0 }
 0x169   : > { %v808_v35 = vadd.f32 %v1502_v28, %v807_v33 }
 0x16b   : > { %v816_v37 = vmax.f32 %v808_v35, 0.0 }
 0x16d   : > { %844 = vmatpush.msra.mxu1 %v816_v37  ;;  %879 = vmatpush.msrb.mxu2 %v816_v37 }
 0x16f   : > { %845 = vmatpush.msra.mxu1 %v815_v39  ;;  %880 = vmatpush.msrb.mxu2 %v815_v39 }
 0x171   : > { %846 = vmatpush.msra.mxu1 %v814_v40  ;;  %881 = vmatpush.msrb.mxu2 %v814_v40 }
 0x173   : > { %847 = vmatpush.msra.mxu1 %v813_v41  ;;  %882 = vmatpush.msrb.mxu2 %v813_v41 }
 0x174   : > { %1453 = vmatmul.msk.f32.vlgmr.msrb.gmra.mxu2 %vm818_vm3, %v474_v42  ;;  %1449 = vmatmul.msk.f32.vlgmr.msra.gmra.mxu1 %vm818_vm3, %v471_v43 }
 0x17c   : > { %1454 = vmatmul.msk.f32.gmra.mxu2 %vm818_vm3, %v475_v44  ;;  %1450 = vmatmul.msk.f32.gmra.mxu1 %vm818_vm3, %v472_v45 }
 0x184   : > { %1455 = vmatmul.msk.f32.gmra.mxu2 %vm818_vm3, %v476_v46  ;;  %1451 = vmatmul.msk.f32.gmra.mxu1 %vm818_vm3, %v473_v47  ;;  %vm989_vm3 = vcmask 320768  }
 0x1f1   : > { %v849_v48 = vpop.f32.mrf.mxu1 }
 0x1f7   : > { %v884_v49 = vpop.f32.mrf.mxu2 }
 0x1f8   : > { %v893_v50 = vmax.f32 %v849_v48, %v884_v49 }
 0x1f9   : > { %v852_v51 = vpop.f32.mrf.mxu1 }
 0x1fa   : > { %900 = vst.msk [vmem:[#allocation4 + $0x4] sm:$0xff] %vm899_vm5, %v893_v50 }
 0x1ff   : > { %v887_v52 = vpop.f32.mrf.mxu2 }
 0x200   : > { %v894_v53 = vmax.f32 %v852_v51, %v887_v52  ;;  %v1503_v52 = vld [vmem:[%s1895_s6] ss:$0 sm:$0xff] }
 0x201   : > { %v951_v54 = vld [vmem:[#allocation4 + $0x3] sm:$0xff]  ;;  %v855_v58 = vpop.f32.mrf.mxu1 }
 0x202   : > { %v931_v55 = vld [vmem:[#allocation4 + $0x2] sm:$0xff]  ;;  %901 = vst.msk [vmem:[#allocation4 + $0xc] sm:$0xff] %vm899_vm5, %v894_v53  ;;  %957 = vrot.lane.b32.xlu1 %v951_v54, %s1519_s24 }
 0x203   : > { %v911_v56 = vld [vmem:[#allocation4 + $0x1] sm:$0xff]  ;;  %937 = vrot.lane.b32.xlu0 %v931_v55, %s1518_s23 }
 0x204   : > { %v904_v57 = vld [vmem:[#allocation4] sm:$0xff]  ;;  %917 = vrot.lane.b32.xlu2 %v911_v56, %s1517_s22 }
 0x205   : > { %907 = vst.msk [vmem:[#allocation5] sm:$0xff] %vm899_vm5, %v904_v57  ;;  %v971_v63 = vld [vmem:[#allocation4 + $0x4] sm:$0xff] }
 0x207   : > { %v890_v59 = vpop.f32.mrf.mxu2 }
 0x208   : > { %v895_v60 = vmax.f32 %v855_v58, %v890_v59 }
 0x209   : > { %v1011_v61 = vld [vmem:[#allocation4 + $0x6] sm:$0xff]  ;;  %v906_v2 = vld [vmem:[#allocation4 + $0x10] sm:$0x3]  ;;  %v933_v11 = vld [vmem:[#allocation4 + $0x12] sm:$0x3] }
 0x20a   : > { %v991_v62 = vld [vmem:[#allocation4 + $0x5] sm:$0xff]  ;;  %903 = vst.msk [vmem:[#allocation4 + $0x14] sm:$0x1] %vm902_vm6, %v895_v60  ;;  %1017 = vrot.lane.b32.xlu1 %v1011_v61, %s1521_s26  ;;  %v913_v6 = vld [vmem:[#allocation4 + $0x11] sm:$0x3]  ;;  %vm1049_vm6 = vcmask 517568  }
 0x20b   : > { %997 = vrot.lane.b32.xlu0 %v991_v62, %s1522_s27  ;;  %v905_v1 = vld [vmem:[#allocation4 + $0x8] sm:$0xff]  ;;  %910 = vst.msk [vmem:[#allocation5 + $0x10] sm:$0x3] %vm909_vm7, %v906_v2  ;;  %vm1103_vm7 = vcmask 1041408   ;;  %v488_v60 = vld [vmem:[%s1897_s8] sm:$0xff] }
 0x20c   : > { %977 = vrot.lane.b32.xlu2 %v971_v63, %s1523_s28  ;;  %908 = vst.msk [vmem:[#allocation5 + $0x8] sm:$0xff] %vm899_vm5, %v905_v1  ;;  %v932_v3 = vld [vmem:[#allocation4 + $0xa] sm:$0xff]  ;;  %vm1029_vm5 = vcmask 451968   ;;  %v489_v62 = vld [vmem:[%s1897_s8 + $0x8] sm:$0x3] }
 0x20d   : > { %v912_v4 = vld [vmem:[#allocation4 + $0x9] sm:$0xff]  ;;  %v487_v63 = vld [vmem:[%s1896_s7 + $0x8] sm:$0x3] }
 0x20e   : > { %v1031_v5 = vld [vmem:[#allocation4 + $0x7] sm:$0xff]  ;;  %v486_v61 = vld [vmem:[%s1896_s7] sm:$0xff] }
 0x20f   : > { %v972_v7 = vld [vmem:[#allocation4 + $0xc] sm:$0xff] }
 0x210   : > { %v952_v8 = vld [vmem:[#allocation4 + $0xb] sm:$0xff] }
 0x211   : > { %v1032_v9 = vld [vmem:[#allocation4 + $0xf] sm:$0xff] }
 0x212   : > { %939 = vrot.lane.b32.xlu1 %v932_v3, %s1518_s23  ;;  %v992_v10 = vld [vmem:[#allocation4 + $0xd] sm:$0xff] }
 0x213   : > { %919 = vrot.lane.b32.xlu0 %v912_v4, %s1517_s22  ;;  %v973_v12 = vld [vmem:[#allocation4 + $0x14] sm:$0x3] }
 0x214   : > { %1037 = vrot.lane.b32.xlu2 %v1031_v5, %s1524_s15  ;;  %v953_v13 = vld [vmem:[#allocation4 + $0x13] sm:$0x3] }
 0x215   : > { %v1012_v14 = vld [vmem:[#allocation4 + $0xe] sm:$0xff] }
 0x21a   : > { %921 = vrot.lane.b32.xlu1 %v913_v6, %s1517_s22 }
 0x21b   : > { %979 = vrot.lane.b32.xlu0 %v972_v7, %s1523_s28 }
 0x21c   : > { %959 = vrot.lane.b32.xlu2 %v952_v8, %s1519_s24 }
 0x222   : > { %999 = vrot.lane.b32.xlu1 %v992_v10, %s1522_s27 }
 0x223   : > { %1039 = vrot.lane.b32.xlu0 %v1032_v9, %s1524_s15 }
 0x224   : > { %941 = vrot.lane.b32.xlu2 %v933_v11, %s1518_s23 }
 0x22a   : > { %981 = vrot.lane.b32.xlu1 %v973_v12, %s1523_s28 }
 0x22b   : > { %961 = vrot.lane.b32.xlu0 %v953_v13, %s1519_s24  ;;  %s1525_s24 = smov 96  }
 0x22c   : > { %1019 = vrot.lane.b32.xlu2 %v1012_v14, %s1521_s26 }
 0x232   : > { %1041 = vrot.lane.b32.xlu1 %v1033_v16, %s1524_s15 }
 0x233   : > { %1021 = vrot.lane.b32.xlu0 %v1013_v15, %s1521_s26 }
 0x234   : > { %1001 = vrot.lane.b32.xlu2 %v993_v17, %s1522_s27 }
 0x25e   : > { %v918_v21 = vpop.permute.xlu2 %917 }
 0x25f   : > { %927 = vst.msk [vmem:[#allocation5] sm:$0xff] %vm926_vm8, %v918_v21 }
 0x266   : > { %v978_v27 = vpop.permute.xlu2 %977 }
 0x26e   : > { %v1038_v30 = vpop.permute.xlu2 %1037 }
 0x274   : > { %v958_v28 = vpop.permute.xlu1 %957 }
 0x275   : > { %v938_v29 = vpop.permute.xlu0 %937 }
 0x276   : > { %947 = vst.msk [vmem:[#allocation5] sm:$0xff] %vm946_vm9, %v938_v29  ;;  %v960_v33 = vpop.permute.xlu2 %959 }
 0x277   : > { %967 = vst.msk [vmem:[#allocation5] sm:$0xff] %vm966_vm10, %v958_v28  ;;  %v499_v28 = vld [vmem:[%s1898_s9 + $0x48] sm:$0xff] }
 0x278   : > { %987 = vst.msk [vmem:[#allocation5] sm:$0xff] %vm986_vm11, %v978_v27  ;;  %v500_v27 = vld [vmem:[%s1898_s9 + $0x50] sm:$0xff] }
 0x279   : > { %1281 = vmatpush.msrb.mxu0 %v500_v27 }
 0x27b   : > { %1282 = vmatpush.msrb.mxu0 %v499_v28 }
 0x27c   : > { %v1018_v31 = vpop.permute.xlu1 %1017 }
 0x27d   : > { %v998_v32 = vpop.permute.xlu0 %997 }
 0x27e   : > { %1007 = vst.msk [vmem:[#allocation5] sm:$0xff] %vm1006_vm12, %v998_v32  ;;  %v942_v37 = vpop.permute.xlu2 %941  ;;  %v496_v32 = vld [vmem:[%s1898_s9 + $0x30] sm:$0xff] }
 0x27f   : > { %1027 = vst.msk [vmem:[#allocation5] sm:$0xff] %vm1026_vm13, %v1018_v31  ;;  %v497_v31 = vld [vmem:[%s1898_s9 + $0x38] sm:$0xff] }
 0x280   : > { %1047 = vst.msk [vmem:[#allocation5] sm:$0xff] %vm1046_vm14, %v1038_v30  ;;  %v498_v30 = vld [vmem:[%s1898_s9 + $0x40] sm:$0xff] }
 0x281   : > { %1283 = vmatpush.msrb.mxu0 %v498_v30 }
 0x283   : > { %1284 = vmatpush.msrb.mxu0 %v497_v31 }
 0x284   : > { %v940_v34 = vpop.permute.xlu1 %939 }
 0x285   : > { %v920_v35 = vpop.permute.xlu0 %919  ;;  %1285 = vmatpush.msrb.mxu0 %v496_v32 }
 0x286   : > { %928 = vst.msk [vmem:[#allocation5 + $0x8] sm:$0xff] %vm926_vm8, %v920_v35  ;;  %v1020_v40 = vpop.permute.xlu2 %1019  ;;  %vm1096_vm8 = vcmask 146432   ;;  %v493_v35 = vld [vmem:[%s1898_s9 + $0x18] sm:$0xff] }
 0x287   : > { %948 = vst.msk [vmem:[#allocation5 + $0x8] sm:$0xff] %vm946_vm9, %v940_v34  ;;  %v1051_v36 = vld [vmem:[#allocation5] sm:$0xff]  ;;  %vm1161_vm9 = vcmask 125952   ;;  %v494_v34 = vld [vmem:[%s1898_s9 + $0x20] sm:$0xff] }
 0x288   : > { %968 = vst.msk [vmem:[#allocation5 + $0x8] sm:$0xff] %vm966_vm10, %v960_v33  ;;  %1456 = vmatmul.msk.f32.vlgmr.msra.gmra.mxu3 %vm1057_vm15, %v1051_v36  ;;  %vm1164_vm10 = vcmask 130048   ;;  %v495_v33 = vld [vmem:[%s1898_s9 + $0x28] sm:$0xff]  ;;  %v492_v36 = vld [vmem:[%s1898_s9 + $0x10] sm:$0xff] }
 0x289   : > { %1162 = vst.msk [vmem:[#allocation6] sm:$0xf] %vm1161_vm9, %v1513_v0  ;;  %1286 = vmatpush.msrb.mxu0 %v495_v33 }
 0x28a   : > { %1163 = vst.msk [vmem:[#allocation6 + $0xe] sm:$0xf] %vm1161_vm9, %v1513_v0 }
 0x28b   : > { %1287 = vmatpush.msrb.mxu0 %v494_v34 }
 0x28c   : > { %v922_v38 = vpop.permute.xlu1 %921 }
 0x28d   : > { %v980_v39 = vpop.permute.xlu0 %979  ;;  %930 = vst.msk [vmem:[#allocation5 + $0x10] sm:$0x3] %vm929_vm0, %v922_v38  ;;  %1288 = vmatpush.msrb.mxu0 %v493_v35  ;;  %v490_v38 = vld [vmem:[%s1898_s9] sm:$0xff]  ;;  %vm1225_vm0 = vcmask 654848  }
 0x28e   : > { %988 = vst.msk [vmem:[#allocation5 + $0x8] sm:$0xff] %vm986_vm11, %v980_v39  ;;  %v1002_v43 = vpop.permute.xlu2 %1001  ;;  %vm1166_vm11 = vcmask 123904  }
 0x28f   : > { %950 = vst.msk [vmem:[#allocation5 + $0x10] sm:$0x3] %vm949_vm1, %v942_v37  ;;  %v491_v37 = vld [vmem:[%s1898_s9 + $0x8] sm:$0xff]  ;;  %1289 = vmatpush.msrb.mxu0 %v492_v36  ;;  %vm1185_vm1 = vcmask 256128  }
 0x291   : > { %v1258_v20 = vld [vmem:[#allocation6 + $0xf] sm:$0x7]  ;;  %1290 = vmatpush.msrb.mxu0 %v491_v37 }
 0x292   : > { %v1244_v21 = vld [vmem:[#allocation6 + $0xe] sm:$0x7] }
 0x293   : > { %1291 = vmatpush.msrb.mxu0 %v490_v38 }
 0x294   : > { %v1000_v42 = vpop.permute.xlu1 %999 }
 0x295   : > { %v1040_v41 = vpop.permute.xlu0 %1039  ;;  %1008 = vst.msk [vmem:[#allocation5 + $0x8] sm:$0xff] %vm1006_vm12, %v1000_v42  ;;  %vm1171_vm12 = vcmask 124928  }
 0x296   : > { %1028 = vst.msk [vmem:[#allocation5 + $0x8] sm:$0xff] %vm1026_vm13, %v1020_v40  ;;  %vm1183_vm13 = vcmask 261248  }
 0x297   : > { %1048 = vst.msk [vmem:[#allocation5 + $0x8] sm:$0xff] %vm1046_vm14, %v1040_v41  ;;  %vm1197_vm14 = vcmask 392448  }
 0x29c   : > { %v982_v44 = vpop.permute.xlu1 %981 }
 0x29d   : > { %v962_v45 = vpop.permute.xlu0 %961 }
 0x29e   : > { %970 = vst.msk [vmem:[#allocation5 + $0x10] sm:$0x3] %vm969_vm2, %v962_v45  ;;  %v1052_v46 = vld [vmem:[#allocation5 + $0x8] sm:$0xff]  ;;  %vm1239_vm2 = vcmask 786048  }
 0x29f   : > { %990 = vst.msk [vmem:[#allocation5 + $0x10] sm:$0x3] %vm989_vm3, %v982_v44  ;;  %1457 = vmatmul.msk.f32.gmra.mxu3 %vm1057_vm15, %v1052_v46  ;;  %vm1253_vm3 = vcmask 917248  }
 0x2a0   : > { %1010 = vst.msk [vmem:[#allocation5 + $0x10] sm:$0x3] %vm1009_vm4, %v1002_v43  ;;  %vm1267_vm4 = vcmask 1048448  }
 0x2a4   : > { %v1042_v48 = vpop.permute.xlu1 %1041 }
 0x2a5   : > { %v1022_v47 = vpop.permute.xlu0 %1021 }
 0x2a6   : > { %1030 = vst.msk [vmem:[#allocation5 + $0x10] sm:$0x3] %vm1029_vm5, %v1022_v47  ;;  %vm1199_vm5 = vcmask 387328  }
 0x2a7   : > { %1050 = vst.msk [vmem:[#allocation5 + $0x10] sm:$0x3] %vm1049_vm6, %v1042_v48  ;;  %vm1213_vm6 = vcmask 518528  }
 0x2ae   : > { %v1053_v49 = vld [vmem:[#allocation5 + $0x10] sm:$0x3] }
 0x2af   : > { %1458 = vmatmul.msk.f32.gmra.mxu3 %vm1057_vm15, %v1053_v49  ;;  %vm1211_vm15 = vcmask 523648  }
 0x30b   : > { %v1084_v50 = vpop.f32.mrf.mxu3 }
 0x30c   : > { %v1085_v56 = vadd.f32 %v1503_v52, %v1084_v50 }
 0x30e   : > { %v1093_v59 = vmax.f32 %v1085_v56, 0.0 }
 0x322   : > { %v1087_v51 = vpop.f32.mrf.mxu3 }
 0x323   : > { %v1088_v54 = vadd.f32 %v1503_v52, %v1087_v51 }
 0x325   : > { %v1094_v58 = vmax.f32 %v1088_v54, 0.0 }
 0x332   : > { %v1090_v53 = vpop.f32.mrf.mxu3 }
 0x333   : > { %v1091_v55 = vadd.f32 %v1503_v52, %v1090_v53 }
 0x335   : > { %v1095_v57 = vmax.f32 %v1091_v55, 0.0  ;;  %v1504_v55 = vld [vmem:[%s1899_s10] ss:$0 sm:$0xff] }
 0x337   : > { %1459 = vmatpush.msk.msrb.mxu1 %vm1103_vm7, %v1095_v57  ;;  %1462 = vmatpush.msk.msra.mxu2 %vm1103_vm7, %v1095_v57  ;;  %vm1227_vm7 = vcmask 649728  }
 0x339   : > { %1121 = vmatpush.msrb.mxu1 %v1094_v58  ;;  %1150 = vmatpush.msra.mxu2 %v1094_v58 }
 0x33b   : > { %1122 = vmatpush.msrb.mxu1 %v1093_v59  ;;  %1151 = vmatpush.msra.mxu2 %v1093_v59 }
 0x33c   : > { %1463 = vmatmul.msk.f32.vlgmr.msra.gmra.mxu2 %vm1096_vm8, %v488_v60  ;;  %1460 = vmatmul.msk.f32.vlgmr.msrb.gmra.mxu1 %vm1096_vm8, %v486_v61  ;;  %v507_v61 = vld [vmem:[%s1900_s11] sm:$0x3f] }
 0x344   : > { %1464 = vmatmul.msk.f32.gmra.mxu2 %vm1096_vm8, %v489_v62  ;;  %1461 = vmatmul.msk.f32.gmra.mxu1 %vm1096_vm8, %v487_v63  ;;  %vm1241_vm8 = vcmask 780928   ;;  %v508_v62 = vld [vmem:[%s1901_s12] sm:$0x3f] }
 0x3b9   : > { %v1124_v1 = vpop.f32.mrf.mxu1 }
 0x3bf   : > { %v1153_v2 = vpop.f32.mrf.mxu2 }
 0x3c0   : > { %v1159_v3 = vmax.f32 %v1124_v1, %v1153_v2 }
 0x3c1   : > { %v1127_v4 = vpop.f32.mrf.mxu1 }
 0x3c2   : > { %1165 = vst.msk [vmem:[#allocation6 + $0x4] sm:$0xff] %vm1164_vm10, %v1159_v3  ;;  %v509_v3 = vld [vmem:[%s1902_s13] sm:$0xf] }
 0x3c7   : > { %v1156_v5 = vpop.f32.mrf.mxu2 }
 0x3c8   : > { %v1160_v6 = vmax.f32 %v1127_v4, %v1156_v5 }
 0x3c9   : > { %v1201_v7 = vld [vmem:[#allocation6 + $0x3] sm:$0xff] }
 0x3ca   : > { %v1187_v8 = vld [vmem:[#allocation6 + $0x2] sm:$0xff]  ;;  %1167 = vst.msk [vmem:[#allocation6 + $0xc] sm:$0x3] %vm1166_vm11, %v1160_v6  ;;  %1205 = vrot.lane.b32.xlu1 %v1201_v7, %s1521_s26  ;;  %vm1269_vm11 = vcmask 1043328  }
 0x3cb   : > { %v1173_v9 = vld [vmem:[#allocation6 + $0x1] sm:$0xff]  ;;  %1191 = vrot.lane.b32.xlu0 %v1187_v8, %s1523_s28  ;;  %v1174_v11 = vld [vmem:[#allocation6 + $0x9] sm:$0x7] }
 0x3cc   : > { %v1168_v0 = vld [vmem:[#allocation6] sm:$0xff]  ;;  %1177 = vrot.lane.b32.xlu2 %v1173_v9, %s1518_s23  ;;  %v1169_v10 = vld [vmem:[#allocation6 + $0x8] sm:$0x7] }
 0x3cd   : > { %1170 = vst.msk [vmem:[#allocation7] sm:$0xff] %vm1164_vm10, %v1168_v0  ;;  %v1215_v13 = vld [vmem:[#allocation6 + $0x4] sm:$0xff]  ;;  %vm1255_vm10 = vcmask 912128  }
 0x3ce   : > { %1172 = vst.msk [vmem:[#allocation7 + $0x8] sm:$0x7] %vm1171_vm12, %v1169_v10  ;;  %vm1305_vm12 = vcmask 1042432  }
 0x3d1   : > { %v1243_v12 = vld [vmem:[#allocation6 + $0x6] sm:$0xff] }
 0x3d2   : > { %1247 = vrot.lane.b32.xlu1 %v1243_v12, %s1525_s24  ;;  %v1229_v14 = vld [vmem:[#allocation6 + $0x5] sm:$0xff]  ;;  %v1230_v18 = vld [vmem:[#allocation6 + $0xd] sm:$0x7] }
 0x3d3   : > { %1179 = vrot.lane.b32.xlu0 %v1174_v11, %s1518_s23  ;;  %v1188_v15 = vld [vmem:[#allocation6 + $0xa] sm:$0x7] }
 0x3d4   : > { %1219 = vrot.lane.b32.xlu2 %v1215_v13, %s1526_s19  ;;  %v1257_v16 = vld [vmem:[#allocation6 + $0x7] sm:$0xff] }
 0x3d5   : > { %v1216_v17 = vld [vmem:[#allocation6 + $0xc] sm:$0x7] }
 0x3d6   : > { %v1202_v19 = vld [vmem:[#allocation6 + $0xb] sm:$0x7] }
 0x3da   : > { %1193 = vrot.lane.b32.xlu1 %v1188_v15, %s1523_s28 }
 0x3db   : > { %1233 = vrot.lane.b32.xlu0 %v1229_v14, %s1527_s20 }
 0x3dc   : > { %1261 = vrot.lane.b32.xlu2 %v1257_v16, %s1528_s21 }
 0x3e2   : > { %1235 = vrot.lane.b32.xlu1 %v1230_v18, %s1527_s20  ;;  %s1442_s20 = sshll.u32 %s1905_s30, 2 }
 0x3e3   : > { %1221 = vrot.lane.b32.xlu0 %v1216_v17, %s1526_s19  ;;  %s465_s25 = scalar_lea.vmem %s1903_s14, %s1442_s20 }
 0x3e4   : > { %1207 = vrot.lane.b32.xlu2 %v1202_v19, %s1521_s26 }
 0x3eb   : > { %1263 = vrot.lane.b32.xlu0 %v1258_v20, %s1528_s21 }
 0x3ec   : > { %1249 = vrot.lane.b32.xlu2 %v1244_v21, %s1525_s24 }
 0x426   : > { %v1178_v29 = vpop.permute.xlu2 %1177 }
 0x427   : > { %1184 = vst.msk [vmem:[#allocation7] sm:$0xff] %vm1183_vm13, %v1178_v29  ;;  %vm1301_vm13 = vcmask 89088  }
 0x42e   : > { %v1220_v39 = vpop.permute.xlu2 %1219 }
 0x436   : > { %v1262_v42 = vpop.permute.xlu2 %1261 }
 0x43c   : > { %v1206_v40 = vpop.permute.xlu1 %1205 }
 0x43d   : > { %v1192_v41 = vpop.permute.xlu0 %1191 }
 0x43e   : > { %1198 = vst.msk [vmem:[#allocation7] sm:$0xff] %vm1197_vm14, %v1192_v41  ;;  %v1208_v45 = vpop.permute.xlu2 %1207  ;;  %vm1357_vm14 = vcmask 1045504  }
 0x43f   : > { %1212 = vst.msk [vmem:[#allocation7] sm:$0xff] %vm1211_vm15, %v1206_v40  ;;  %vm1353_vm15 = vcmask 48128  }
 0x440   : > { %1226 = vst.msk [vmem:[#allocation7] sm:$0xff] %vm1225_vm0, %v1220_v39 }
 0x444   : > { %v1248_v44 = vpop.permute.xlu1 %1247 }
 0x445   : > { %v1180_v43 = vpop.permute.xlu0 %1179 }
 0x446   : > { %1186 = vst.msk [vmem:[#allocation7 + $0x8] sm:$0x7] %vm1185_vm1, %v1180_v43  ;;  %v1250_v48 = vpop.permute.xlu2 %1249 }
 0x44c   : > { %v1194_v47 = vpop.permute.xlu1 %1193 }
 0x44d   : > { %v1234_v46 = vpop.permute.xlu0 %1233  ;;  %1200 = vst.msk [vmem:[#allocation7 + $0x8] sm:$0x7] %vm1199_vm5, %v1194_v47 }
 0x44e   : > { %1240 = vst.msk [vmem:[#allocation7] sm:$0xff] %vm1239_vm2, %v1234_v46 }
 0x44f   : > { %1254 = vst.msk [vmem:[#allocation7] sm:$0xff] %vm1253_vm3, %v1248_v44 }
 0x450   : > { %1268 = vst.msk [vmem:[#allocation7] sm:$0xff] %vm1267_vm4, %v1262_v42 }
 0x451   : > { %1214 = vst.msk [vmem:[#allocation7 + $0x8] sm:$0x7] %vm1213_vm6, %v1208_v45 }
 0x454   : > { %v1236_v50 = vpop.permute.xlu1 %1235 }
 0x455   : > { %v1222_v49 = vpop.permute.xlu0 %1221 }
 0x456   : > { %1228 = vst.msk [vmem:[#allocation7 + $0x8] sm:$0x7] %vm1227_vm7, %v1222_v49 }
 0x457   : > { %1242 = vst.msk [vmem:[#allocation7 + $0x8] sm:$0x7] %vm1241_vm8, %v1236_v50  ;;  %v1271_v51 = vld [vmem:[#allocation7] sm:$0xff] }
 0x458   : > { %1292 = vmatmul.f32.vlgmr.msrb.gmra.mxu0 %v1271_v51  ;;  %1256 = vst.msk [vmem:[#allocation7 + $0x8] sm:$0x7] %vm1255_vm10, %v1250_v48 }
 0x45d   : > { %v1264_v52 = vpop.permute.xlu0 %1263 }
 0x45e   : > { %1270 = vst.msk [vmem:[#allocation7 + $0x8] sm:$0x7] %vm1269_vm11, %v1264_v52 }
 0x465   : > { %v1272_v53 = vld [vmem:[#allocation7 + $0x8] sm:$0x7] }
 0x466   : > { %1295 = vmatmul.f32.gmra.mxu0 %v1272_v53 }
 0x4d5   : > { %v1293_v54 = vpop.f32.mrf.mxu0 }
 0x4d6   : > { %v1294_v57 = vadd.f32 %v1504_v55, %v1293_v54 }
 0x4d8   : > { %v1299_v60 = vmax.f32 %v1294_v57, 0.0 }
 0x4e3   : > { %v1296_v56 = vpop.f32.mrf.mxu0 }
 0x4e4   : > { %v1297_v58 = vadd.f32 %v1504_v55, %v1296_v56 }
 0x4e6   : > { %v1300_v59 = vmax.f32 %v1297_v58, 0.0 }
 0x4e8   : > { %1465 = vmatpush.msk.msrb.mxu3 %vm1305_vm12, %v1300_v59 }
 0x4ea   : > { %1324 = vmatpush.msrb.mxu3 %v1299_v60 }
 0x4eb   : > { %1466 = vmatmul.msk.f32.vlgmr.msrb.gmra.mxu3 %vm1301_vm13, %v507_v61 }
 0x4ec   : > { %1467 = vmatpush.msk.msra.mxu3 %vm1305_vm12, %v1300_v59 }
 0x4ee   : > { %1347 = vmatpush.msra.mxu3 %v1299_v60 }
 0x4f3   : > { %1468 = vmatmul.msk.f32.vlgmr.msra.gmra.mxu3 %vm1301_vm13, %v508_v62 }
 0x56e   : > { %v1326_v63 = vpop.f32.mrf.mxu3 }
 0x576   : > { %v1349_v1 = vpop.f32.mrf.mxu3 }
 0x577   : > { %v1352_v2 = vmax.f32 %v1326_v63, %v1349_v1 }
 0x579   : > { %1469 = vmatpush.msk.msra.mxu1 %vm1357_vm14, %v1352_v2 }
 0x57a   : > { %1470 = vmatmul.msk.f32.vlgmr.msra.gmra.mxu1 %vm1353_vm15, %v509_v3 }
 0x5f7   : > { %v1378_v4 = vpop.f32.mrf.mxu1 }
 0x5f8   : > { %1381 = vst.msk [vmem:[%s465_s25] sm:$0xf] %vm1161_vm9, %v1378_v4 }
 0x5f9 PF: > { %s24_s29 = sadd.s32 1, %s1511_s29  }
 0x5fa   : > { %p21_p4 = scmp.ge.s32.totalorder %s24_s29, 4  }
 0x5fc   :  { %23 = sbr.rel (!%p21_p4) target bundleno = 1 (0x1), region = 106 }

</bundles_post_ra>
